<compile_context>
chip_gen: v5e
topology: v5e:2x2
jax: 0.10.0
libtpu: 0.0.40
codegen_flags: <defaults>
</compile_context>

<pallas_src>
import functools

import jax
import jax.numpy as jnp
from jax.experimental import pallas as pl
from jax.experimental.pallas import tpu as pltpu

BN_EPS = 1e-5


def _pick_vmem_limit_bytes():
    # ~3/4 of physical VMEM: ~96 MiB on v5e/v6e (128 MiB), ~48 MiB on v7x (64 MiB).
    try:
        cap = int(pltpu.get_tpu_info().vmem_capacity_bytes)
        return min(cap * 3 // 4, 100 * 1024 * 1024)
    except Exception:
        return 32 * 1024 * 1024


_CPARAMS = pltpu.CompilerParams(vmem_limit_bytes=_pick_vmem_limit_bytes())


# ----------------------------- kernel body ---------------------------------

def _bn_relu(acc, fold, spread, gamma, beta, n_pixels):
    """Train-mode BatchNorm + ReLU on a lane-dense (rows, W*C) slab.

    fold:   (W*C, C) 0/1 matrix summing the W lane-slots of each channel.
    spread: (C, W*C) 0/1 matrix broadcasting a per-channel value to its lanes.
    Uses a two-pass (centered) variance to avoid E[x^2]-E[x]^2 cancellation.
    """
    inv_n = 1.0 / n_pixels
    mean = jnp.dot(jnp.sum(acc, axis=0, keepdims=True), fold,
                   preferred_element_type=jnp.float32) * inv_n          # (1, C)
    centered = acc - jnp.dot(mean, spread, preferred_element_type=jnp.float32)
    var = jnp.dot(jnp.sum(centered * centered, axis=0, keepdims=True), fold,
                  preferred_element_type=jnp.float32) * inv_n           # (1, C)
    scale = gamma * jax.lax.rsqrt(var + BN_EPS)                         # (1, C)
    scale_l = jnp.dot(scale, spread, preferred_element_type=jnp.float32)
    beta_l = jnp.dot(beta, spread, preferred_element_type=jnp.float32)
    return jnp.maximum(centered * scale_l + beta_l, 0.0)


def encoder_kernel(xp_ref, m1_ref, m2_ref, d3b3_ref,
                   f1_ref, s1_ref, bn1_ref,
                   f2_ref, s2_ref, bn2_ref,
                   o_ref, *, H, W):
    R = o_ref.shape[0]                       # B*H pixel rows
    n_pix = R * W                            # pixels per channel for BN stats
    row = jax.lax.broadcasted_iota(jnp.int32, (R, 1), 0)
    h = row % H                              # image-local row index

    def conv3x3(src_padded, m_ref):
        # src_padded: (R+2, Lin) slab with zero rows at 0 and R+1.
        # m_ref: (3, Lin, Lout) banded per-row-tap weight matrices.
        acc = None
        for kh in range(3):
            dh = kh - 1
            xs = src_padded[1 + dh:1 + dh + R, :]
            if dh != 0:                      # zero rows that cross an image edge
                valid = jnp.logical_and(h + dh >= 0, h + dh < H)
                xs = jnp.where(valid, xs, 0.0)
            part = jnp.dot(xs, m_ref[kh], preferred_element_type=jnp.float32)
            acc = part if acc is None else acc + part
        return acc

    # Stage 1: conv1 (3x3) + BN(16) + ReLU, in the (R, W*16) slab.
    y1 = _bn_relu(conv3x3(xp_ref[...], m1_ref),
                  f1_ref[...], s1_ref[...],
                  bn1_ref[0:1, :], bn1_ref[1:2, :], n_pix)

    # Stage 2: conv2 (3x3) + BN(8) + ReLU; y1 stays on-chip (no HBM round-trip).
    zrow = jnp.zeros((1, y1.shape[1]), jnp.float32)
    y1p = jnp.concatenate([zrow, y1, zrow], axis=0)
    y2 = _bn_relu(conv3x3(y1p, m2_ref),
                  f2_ref[...], s2_ref[...],
                  bn2_ref[0:1, :], bn2_ref[1:2, :], n_pix)

    # Stage 3: 1x1 conv as a block-diagonal matmul + bias; lane-dense store.
    WC = o_ref.shape[1]                      # W*8
    d3 = d3b3_ref[0:WC, :]
    b3_l = d3b3_ref[WC:WC + 1, :]
    o_ref[...] = jnp.dot(y2, d3, preferred_element_type=jnp.float32) + b3_l


# ------------------------ derived-parameter prep ----------------------------

def _banded_conv_matrices(w_hwio, W):
    """(3,3,Cin,Cout) HWIO 3x3 weights -> (3, W*Cin, W*Cout) banded matrices.

    m[kh][wi*Cin+ci, wo*Cout+co] = w[kh, wi-wo+1, ci, co] when |wi-wo| <= 1,
    else 0 — one matrix per row tap; the band encodes the kw taps and the
    'SAME' zero padding along W.
    """
    _, _, cin, cout = w_hwio.shape
    wi = jnp.arange(W)[:, None]
    wo = jnp.arange(W)[None, :]
    d = wi - wo                                              # (W, W)
    valid = jnp.abs(d) <= 1
    kw_idx = jnp.clip(d + 1, 0, 2)
    mats = []
    for kh in range(3):
        blocks = w_hwio[kh][kw_idx]                          # (W, W, Cin, Cout)
        blocks = jnp.where(valid[:, :, None, None], blocks, 0.0)
        mats.append(jnp.transpose(blocks, (0, 2, 1, 3)).reshape(W * cin, W * cout))
    return jnp.stack(mats, axis=0)


def _fold_spread(C, W):
    eye = jnp.eye(C, dtype=jnp.float32)
    fold = jnp.tile(eye, (W, 1))        # (W*C, C)
    spread = jnp.tile(eye, (1, W))      # (C, W*C)
    return fold, spread


def prepare_params(params, W):
    """Weight-derived matrices the kernel consumes (computed once per W)."""
    d3 = jnp.kron(jnp.eye(W, dtype=jnp.float32), params["w3"])      # (W*8, W*8)
    b3_l = jnp.tile(params["b3"].reshape(1, 8), (1, W))             # (1, W*8)
    f1, s1 = _fold_spread(16, W)
    f2, s2 = _fold_spread(8, W)
    return {
        "m1": _banded_conv_matrices(params["w1"], W),               # (3, W*Cin, W*16)
        "m2": _banded_conv_matrices(params["w2"], W),               # (3, W*16, W*8)
        "d3b3": jnp.concatenate([d3, b3_l], axis=0),                # (W*8+1, W*8)
        "f1": f1, "s1": s1,
        "bn1": jnp.concatenate([params["g1"], params["be1"]], axis=0),   # (2,16)
        "f2": f2, "s2": s2,
        "bn2": jnp.concatenate([params["g2"], params["be2"]], axis=0),   # (2,8)
    }


# -------------------------------- wrapper -----------------------------------

@jax.jit
def encoder_forward(x_nchw, prep):
    B, Cin, H, W = x_nchw.shape
    x = jnp.transpose(x_nchw, (0, 2, 3, 1)).astype(jnp.float32)     # NHWC
    x_slab = x.reshape(B * H, W * Cin)                              # lane-dense slab
    zrow = jnp.zeros((1, W * Cin), jnp.float32)
    xp = jnp.concatenate([zrow, x_slab, zrow], axis=0)              # row pad (H pad)

    kernel = functools.partial(encoder_kernel, H=H, W=W)
    out_slab = pl.pallas_call(
        kernel,
        out_shape=jax.ShapeDtypeStruct((B * H, W * 8), jnp.float32),
        compiler_params=_CPARAMS,
    )(xp, prep["m1"], prep["m2"], prep["d3b3"],
      prep["f1"], prep["s1"], prep["bn1"],
      prep["f2"], prep["s2"], prep["bn2"])

    out = out_slab.reshape(B, H, W, 8)
    return jnp.transpose(out, (0, 3, 1, 2))                         # NCHW


def init_params(key, in_channels):
    ks = jax.random.split(key, 6)
    return {
        # conv1: (3,3,Cin,16) HWIO ; conv2: (3,3,16,8) ; conv3 1x1: (Cin=8, Cout=8)
        "w1": jax.random.normal(ks[0], (3, 3, in_channels, 16), jnp.float32) * 0.1,
        "b1": jax.random.normal(ks[1], (1, 16), jnp.float32) * 0.1,
        "g1": jnp.ones((1, 16), jnp.float32),
        "be1": jnp.zeros((1, 16), jnp.float32),
        "w2": jax.random.normal(ks[2], (3, 3, 16, 8), jnp.float32) * 0.1,
        "b2": jax.random.normal(ks[3], (1, 8), jnp.float32) * 0.1,
        "g2": jnp.ones((1, 8), jnp.float32),
        "be2": jnp.zeros((1, 8), jnp.float32),
        "w3": jax.random.normal(ks[4], (8, 8), jnp.float32) * 0.1,
        "b3": jax.random.normal(ks[5], (1, 8), jnp.float32) * 0.1,
    }


def reference_forward(x_nchw, params):
    # Pure-JAX reference (includes the conv biases, which train-mode BN cancels).
    x = jnp.transpose(x_nchw, (0, 2, 3, 1)).astype(jnp.float32)

    def conv(x, w, b, pad):
        y = jax.lax.conv_general_dilated(
            x, w, window_strides=(1, 1), padding=pad,
            dimension_numbers=("NHWC", "HWIO", "NHWC"))
        return y + b.reshape(1, 1, 1, -1)

    def bn(x, g, be):
        m = jnp.mean(x, axis=(0, 1, 2), keepdims=True)
        v = jnp.mean((x - m) ** 2, axis=(0, 1, 2), keepdims=True)
        return (x - m) * jax.lax.rsqrt(v + BN_EPS) * g.reshape(1, 1, 1, -1) \
            + be.reshape(1, 1, 1, -1)

    y = jnp.maximum(bn(conv(x, params["w1"], params["b1"], "SAME"),
                       params["g1"], params["be1"]), 0.0)
    y = jnp.maximum(bn(conv(y, params["w2"], params["b2"], "SAME"),
                       params["g2"], params["be2"]), 0.0)
    y = conv(y, params["w3"].reshape(1, 1, 8, 8), params["b3"], "VALID")
    return jnp.transpose(y, (0, 3, 1, 2))


if __name__ == "__main__":
    key = jax.random.PRNGKey(0)
    kx, kp = jax.random.split(key)
    B, C, H, W = 2, 4, 16, 16
    x = jax.random.normal(kx, (B, C, H, W), jnp.float32)
    params = init_params(kp, C)

    prep = prepare_params(params, W)
    out = encoder_forward(x, prep)
    out = jax.block_until_ready(out)
    assert out.shape == (B, 8, H, W), out.shape

    ref = reference_forward(x, params)
    assert jnp.allclose(out, ref, rtol=1e-3, atol=1e-3), \
        float(jnp.max(jnp.abs(out - ref)))

    print("KERNEL_OK")
</pallas_src>

<mosaic_0001>
module attributes {stable_mosaic.version = 11 : i64} {
  func.func @encoder_kernel(%arg0: memref<34x64xf32, #tpu.memory_space<vmem>>, %arg1: memref<3x64x256xf32, #tpu.memory_space<vmem>>, %arg2: memref<3x256x128xf32, #tpu.memory_space<vmem>>, %arg3: memref<129x128xf32, #tpu.memory_space<vmem>>, %arg4: memref<256x16xf32, #tpu.memory_space<vmem>>, %arg5: memref<16x256xf32, #tpu.memory_space<vmem>>, %arg6: memref<2x16xf32, #tpu.memory_space<vmem>>, %arg7: memref<128x8xf32, #tpu.memory_space<vmem>>, %arg8: memref<8x128xf32, #tpu.memory_space<vmem>>, %arg9: memref<2x8xf32, #tpu.memory_space<vmem>>, %arg10: memref<32x128xf32, #tpu.memory_space<vmem>>) attributes {dimension_semantics = [], scalar_prefetch = 0 : i64, scratch_operands = 0 : i64, tpu.core_type = #tpu.core_type<tc>} {
    %0 = tpu.iota {dimensions = array<i32: 0>} : vector<32x1xi32>
    %c16_i32 = arith.constant 16 : i32
    %c0_i32 = arith.constant 0 : i32
    %1 = arith.cmpi eq, %c16_i32, %c0_i32 : i32
    %c1_i32 = arith.constant 1 : i32
    %2 = arith.select %1, %c1_i32, %c16_i32 : i32
    %3 = vector.broadcast %2 : i32 to vector<32x1xi32>
    %4 = arith.remsi %0, %3 : vector<32x1xi32>
    %c0_i32_0 = arith.constant 0 : i32
    %5 = vector.broadcast %c0_i32_0 : i32 to vector<32x1xi32>
    %6 = arith.cmpi ne, %4, %5 : vector<32x1xi32>
    %c0_i32_1 = arith.constant 0 : i32
    %7 = vector.broadcast %c0_i32_1 : i32 to vector<32x1xi32>
    %8 = arith.cmpi slt, %4, %7 : vector<32x1xi32>
    %c0_i32_2 = arith.constant 0 : i32
    %9 = arith.cmpi slt, %2, %c0_i32_2 : i32
    %10 = vector.broadcast %9 : i1 to vector<32x1xi1>
    %11 = vector.broadcast %10 : vector<32x1xi1> to vector<32x1xi1>
    %12 = arith.xori %8, %11 : vector<32x1xi1>
    %13 = arith.andi %12, %6 : vector<32x1xi1>
    %14 = vector.broadcast %2 : i32 to vector<32x1xi32>
    %15 = arith.addi %4, %14 : vector<32x1xi32>
    %16 = arith.select %13, %15, %4 : vector<32x1xi1>, vector<32x1xi32>
    %c0 = arith.constant 0 : index
    %c0_3 = arith.constant 0 : index
    %17 = vector.load %arg0[%c0, %c0_3] : memref<34x64xf32, #tpu.memory_space<vmem>>, vector<34x64xf32>
    %18 = vector.extract_strided_slice %17 {offsets = [0, 0], sizes = [32, 64], strides = [1, 1]} : vector<34x64xf32> to vector<32x64xf32>
    %c-1_i32 = arith.constant -1 : i32
    %19 = vector.broadcast %c-1_i32 : i32 to vector<32x1xi32>
    %20 = arith.addi %16, %19 : vector<32x1xi32>
    %c0_i32_4 = arith.constant 0 : i32
    %21 = vector.broadcast %c0_i32_4 : i32 to vector<32x1xi32>
    %22 = arith.cmpi sge, %20, %21 : vector<32x1xi32>
    %c-1_i32_5 = arith.constant -1 : i32
    %23 = vector.broadcast %c-1_i32_5 : i32 to vector<32x1xi32>
    %24 = arith.addi %16, %23 : vector<32x1xi32>
    %c16_i32_6 = arith.constant 16 : i32
    %25 = vector.broadcast %c16_i32_6 : i32 to vector<32x1xi32>
    %26 = arith.cmpi slt, %24, %25 : vector<32x1xi32>
    %27 = arith.andi %22, %26 : vector<32x1xi1>
    %cst = arith.constant 0.000000e+00 : f32
    %28 = vector.shape_cast %27 : vector<32x1xi1> to vector<32x1xi1>
    %29 = vector.broadcast %28 : vector<32x1xi1> to vector<32x64xi1>
    %30 = vector.broadcast %cst : f32 to vector<32x64xf32>
    %31 = arith.select %29, %18, %30 : vector<32x64xi1>, vector<32x64xf32>
    %c0_7 = arith.constant 0 : index
    %c0_8 = arith.constant 0 : index
    %c0_9 = arith.constant 0 : index
    %32 = vector.load %arg1[%c0_7, %c0_8, %c0_9] : memref<3x64x256xf32, #tpu.memory_space<vmem>>, vector<1x64x256xf32>
    %33 = vector.shape_cast %32 : vector<1x64x256xf32> to vector<64x256xf32>
    %cst_10 = arith.constant dense<0.000000e+00> : vector<32x256xf32>
    %34 = tpu.matmul %31, %33, %cst_10 {dimension_numbers = #tpu.dot_dimension_numbers<[1], [0], [0], [1], [0, 0, 1, 1], [], []>} : vector<32x64xf32>, vector<64x256xf32>, vector<32x256xf32> -> vector<32x256xf32>
    %35 = vector.extract_strided_slice %17 {offsets = [1, 0], sizes = [32, 64], strides = [1, 1]} : vector<34x64xf32> to vector<32x64xf32>
    %c1 = arith.constant 1 : index
    %c0_11 = arith.constant 0 : index
    %c0_12 = arith.constant 0 : index
    %36 = vector.load %arg1[%c1, %c0_11, %c0_12] : memref<3x64x256xf32, #tpu.memory_space<vmem>>, vector<1x64x256xf32>
    %37 = vector.shape_cast %36 : vector<1x64x256xf32> to vector<64x256xf32>
    %cst_13 = arith.constant dense<0.000000e+00> : vector<32x256xf32>
    %38 = tpu.matmul %35, %37, %cst_13 {dimension_numbers = #tpu.dot_dimension_numbers<[1], [0], [0], [1], [0, 0, 1, 1], [], []>} : vector<32x64xf32>, vector<64x256xf32>, vector<32x256xf32> -> vector<32x256xf32>
    %39 = arith.addf %34, %38 : vector<32x256xf32>
    %40 = vector.extract_strided_slice %17 {offsets = [2, 0], sizes = [32, 64], strides = [1, 1]} : vector<34x64xf32> to vector<32x64xf32>
    %c1_i32_14 = arith.constant 1 : i32
    %41 = vector.broadcast %c1_i32_14 : i32 to vector<32x1xi32>
    %42 = arith.addi %16, %41 : vector<32x1xi32>
    %c0_i32_15 = arith.constant 0 : i32
    %43 = vector.broadcast %c0_i32_15 : i32 to vector<32x1xi32>
    %44 = arith.cmpi sge, %42, %43 : vector<32x1xi32>
    %c1_i32_16 = arith.constant 1 : i32
    %45 = vector.broadcast %c1_i32_16 : i32 to vector<32x1xi32>
    %46 = arith.addi %16, %45 : vector<32x1xi32>
    %c16_i32_17 = arith.constant 16 : i32
    %47 = vector.broadcast %c16_i32_17 : i32 to vector<32x1xi32>
    %48 = arith.cmpi slt, %46, %47 : vector<32x1xi32>
    %49 = arith.andi %44, %48 : vector<32x1xi1>
    %cst_18 = arith.constant 0.000000e+00 : f32
    %50 = vector.shape_cast %49 : vector<32x1xi1> to vector<32x1xi1>
    %51 = vector.broadcast %50 : vector<32x1xi1> to vector<32x64xi1>
    %52 = vector.broadcast %cst_18 : f32 to vector<32x64xf32>
    %53 = arith.select %51, %40, %52 : vector<32x64xi1>, vector<32x64xf32>
    %c2 = arith.constant 2 : index
    %c0_19 = arith.constant 0 : index
    %c0_20 = arith.constant 0 : index
    %54 = vector.load %arg1[%c2, %c0_19, %c0_20] : memref<3x64x256xf32, #tpu.memory_space<vmem>>, vector<1x64x256xf32>
    %55 = vector.shape_cast %54 : vector<1x64x256xf32> to vector<64x256xf32>
    %cst_21 = arith.constant dense<0.000000e+00> : vector<32x256xf32>
    %56 = tpu.matmul %53, %55, %cst_21 {dimension_numbers = #tpu.dot_dimension_numbers<[1], [0], [0], [1], [0, 0, 1, 1], [], []>} : vector<32x64xf32>, vector<64x256xf32>, vector<32x256xf32> -> vector<32x256xf32>
    %57 = arith.addf %39, %56 : vector<32x256xf32>
    %c0_22 = arith.constant 0 : index
    %c0_23 = arith.constant 0 : index
    %58 = vector.load %arg4[%c0_22, %c0_23] : memref<256x16xf32, #tpu.memory_space<vmem>>, vector<256x16xf32>
    %c0_24 = arith.constant 0 : index
    %c0_25 = arith.constant 0 : index
    %59 = vector.load %arg5[%c0_24, %c0_25] : memref<16x256xf32, #tpu.memory_space<vmem>>, vector<16x256xf32>
    %c0_26 = arith.constant 0 : index
    %c0_27 = arith.constant 0 : index
    %60 = vector.load %arg6[%c0_26, %c0_27] : memref<2x16xf32, #tpu.memory_space<vmem>>, vector<1x16xf32>
    %c1_28 = arith.constant 1 : index
    %c0_29 = arith.constant 0 : index
    %61 = vector.load %arg6[%c1_28, %c0_29] : memref<2x16xf32, #tpu.memory_space<vmem>>, vector<1x16xf32>
    %cst_30 = arith.constant dense<0.000000e+00> : vector<256xf32>
    %62 = vector.multi_reduction <add>, %57, %cst_30 [0] : vector<32x256xf32> to vector<256xf32>
    %63 = vector.shape_cast %62 : vector<256xf32> to vector<1x256xf32>
    %cst_31 = arith.constant dense<0.000000e+00> : vector<1x16xf32>
    %64 = tpu.matmul %63, %58, %cst_31 {dimension_numbers = #tpu.dot_dimension_numbers<[1], [0], [0], [1], [0, 0, 1, 1], [], []>} : vector<1x256xf32>, vector<256x16xf32>, vector<1x16xf32> -> vector<1x16xf32>
    %cst_32 = arith.constant 0.001953125 : f32
    %65 = vector.broadcast %cst_32 : f32 to vector<1x16xf32>
    %66 = arith.mulf %64, %65 : vector<1x16xf32>
    %cst_33 = arith.constant dense<0.000000e+00> : vector<1x256xf32>
    %67 = tpu.matmul %66, %59, %cst_33 {dimension_numbers = #tpu.dot_dimension_numbers<[1], [0], [0], [1], [0, 0, 1, 1], [], []>} : vector<1x16xf32>, vector<16x256xf32>, vector<1x256xf32> -> vector<1x256xf32>
    %68 = vector.broadcast %67 : vector<1x256xf32> to vector<32x256xf32>
    %69 = arith.subf %57, %68 : vector<32x256xf32>
    %70 = arith.mulf %69, %69 : vector<32x256xf32>
    %cst_34 = arith.constant dense<0.000000e+00> : vector<256xf32>
    %71 = vector.multi_reduction <add>, %70, %cst_34 [0] : vector<32x256xf32> to vector<256xf32>
    %72 = vector.shape_cast %71 : vector<256xf32> to vector<1x256xf32>
    %cst_35 = arith.constant dense<0.000000e+00> : vector<1x16xf32>
    %73 = tpu.matmul %72, %58, %cst_35 {dimension_numbers = #tpu.dot_dimension_numbers<[1], [0], [0], [1], [0, 0, 1, 1], [], []>} : vector<1x256xf32>, vector<256x16xf32>, vector<1x16xf32> -> vector<1x16xf32>
    %cst_36 = arith.constant 0.001953125 : f32
    %74 = vector.broadcast %cst_36 : f32 to vector<1x16xf32>
    %75 = arith.mulf %73, %74 : vector<1x16xf32>
    %cst_37 = arith.constant 9.99999974E-6 : f32
    %76 = vector.broadcast %cst_37 : f32 to vector<1x16xf32>
    %77 = arith.addf %75, %76 : vector<1x16xf32>
    %78 = math.rsqrt %77 : vector<1x16xf32>
    %79 = arith.mulf %60, %78 : vector<1x16xf32>
    %cst_38 = arith.constant dense<0.000000e+00> : vector<1x256xf32>
    %80 = tpu.matmul %79, %59, %cst_38 {dimension_numbers = #tpu.dot_dimension_numbers<[1], [0], [0], [1], [0, 0, 1, 1], [], []>} : vector<1x16xf32>, vector<16x256xf32>, vector<1x256xf32> -> vector<1x256xf32>
    %cst_39 = arith.constant dense<0.000000e+00> : vector<1x256xf32>
    %81 = tpu.matmul %61, %59, %cst_39 {dimension_numbers = #tpu.dot_dimension_numbers<[1], [0], [0], [1], [0, 0, 1, 1], [], []>} : vector<1x16xf32>, vector<16x256xf32>, vector<1x256xf32> -> vector<1x256xf32>
    %82 = vector.broadcast %80 : vector<1x256xf32> to vector<32x256xf32>
    %83 = arith.mulf %69, %82 : vector<32x256xf32>
    %84 = vector.broadcast %81 : vector<1x256xf32> to vector<32x256xf32>
    %85 = arith.addf %83, %84 : vector<32x256xf32>
    %cst_40 = arith.constant 0.000000e+00 : f32
    %86 = vector.broadcast %cst_40 : f32 to vector<32x256xf32>
    %87 = arith.maximumf %85, %86 : vector<32x256xf32>
    %cst_41 = arith.constant 0.000000e+00 : f32
    %88 = vector.broadcast %cst_41 : f32 to vector<1x256xf32>
    %89 = tpu.concatenate %88, %87, %88 in 0 : vector<1x256xf32>, vector<32x256xf32>, vector<1x256xf32> -> vector<34x256xf32>
    %90 = vector.extract_strided_slice %89 {offsets = [0, 0], sizes = [32, 256], strides = [1, 1]} : vector<34x256xf32> to vector<32x256xf32>
    %c-1_i32_42 = arith.constant -1 : i32
    %91 = vector.broadcast %c-1_i32_42 : i32 to vector<32x1xi32>
    %92 = arith.addi %16, %91 : vector<32x1xi32>
    %c0_i32_43 = arith.constant 0 : i32
    %93 = vector.broadcast %c0_i32_43 : i32 to vector<32x1xi32>
    %94 = arith.cmpi sge, %92, %93 : vector<32x1xi32>
    %c-1_i32_44 = arith.constant -1 : i32
    %95 = vector.broadcast %c-1_i32_44 : i32 to vector<32x1xi32>
    %96 = arith.addi %16, %95 : vector<32x1xi32>
    %c16_i32_45 = arith.constant 16 : i32
    %97 = vector.broadcast %c16_i32_45 : i32 to vector<32x1xi32>
    %98 = arith.cmpi slt, %96, %97 : vector<32x1xi32>
    %99 = arith.andi %94, %98 : vector<32x1xi1>
    %cst_46 = arith.constant 0.000000e+00 : f32
    %100 = vector.shape_cast %99 : vector<32x1xi1> to vector<32x1xi1>
    %101 = vector.broadcast %100 : vector<32x1xi1> to vector<32x256xi1>
    %102 = vector.broadcast %cst_46 : f32 to vector<32x256xf32>
    %103 = arith.select %101, %90, %102 : vector<32x256xi1>, vector<32x256xf32>
    %c0_47 = arith.constant 0 : index
    %c0_48 = arith.constant 0 : index
    %c0_49 = arith.constant 0 : index
    %104 = vector.load %arg2[%c0_47, %c0_48, %c0_49] : memref<3x256x128xf32, #tpu.memory_space<vmem>>, vector<1x256x128xf32>
    %105 = vector.shape_cast %104 : vector<1x256x128xf32> to vector<256x128xf32>
    %cst_50 = arith.constant dense<0.000000e+00> : vector<32x128xf32>
    %106 = tpu.matmul %103, %105, %cst_50 {dimension_numbers = #tpu.dot_dimension_numbers<[1], [0], [0], [1], [0, 0, 1, 1], [], []>} : vector<32x256xf32>, vector<256x128xf32>, vector<32x128xf32> -> vector<32x128xf32>
    %107 = vector.extract_strided_slice %89 {offsets = [1, 0], sizes = [32, 256], strides = [1, 1]} : vector<34x256xf32> to vector<32x256xf32>
    %c1_51 = arith.constant 1 : index
    %c0_52 = arith.constant 0 : index
    %c0_53 = arith.constant 0 : index
    %108 = vector.load %arg2[%c1_51, %c0_52, %c0_53] : memref<3x256x128xf32, #tpu.memory_space<vmem>>, vector<1x256x128xf32>
    %109 = vector.shape_cast %108 : vector<1x256x128xf32> to vector<256x128xf32>
    %cst_54 = arith.constant dense<0.000000e+00> : vector<32x128xf32>
    %110 = tpu.matmul %107, %109, %cst_54 {dimension_numbers = #tpu.dot_dimension_numbers<[1], [0], [0], [1], [0, 0, 1, 1], [], []>} : vector<32x256xf32>, vector<256x128xf32>, vector<32x128xf32> -> vector<32x128xf32>
    %111 = arith.addf %106, %110 : vector<32x128xf32>
    %112 = vector.extract_strided_slice %89 {offsets = [2, 0], sizes = [32, 256], strides = [1, 1]} : vector<34x256xf32> to vector<32x256xf32>
    %c1_i32_55 = arith.constant 1 : i32
    %113 = vector.broadcast %c1_i32_55 : i32 to vector<32x1xi32>
    %114 = arith.addi %16, %113 : vector<32x1xi32>
    %c0_i32_56 = arith.constant 0 : i32
    %115 = vector.broadcast %c0_i32_56 : i32 to vector<32x1xi32>
    %116 = arith.cmpi sge, %114, %115 : vector<32x1xi32>
    %c1_i32_57 = arith.constant 1 : i32
    %117 = vector.broadcast %c1_i32_57 : i32 to vector<32x1xi32>
    %118 = arith.addi %16, %117 : vector<32x1xi32>
    %c16_i32_58 = arith.constant 16 : i32
    %119 = vector.broadcast %c16_i32_58 : i32 to vector<32x1xi32>
    %120 = arith.cmpi slt, %118, %119 : vector<32x1xi32>
    %121 = arith.andi %116, %120 : vector<32x1xi1>
    %cst_59 = arith.constant 0.000000e+00 : f32
    %122 = vector.shape_cast %121 : vector<32x1xi1> to vector<32x1xi1>
    %123 = vector.broadcast %122 : vector<32x1xi1> to vector<32x256xi1>
    %124 = vector.broadcast %cst_59 : f32 to vector<32x256xf32>
    %125 = arith.select %123, %112, %124 : vector<32x256xi1>, vector<32x256xf32>
    %c2_60 = arith.constant 2 : index
    %c0_61 = arith.constant 0 : index
    %c0_62 = arith.constant 0 : index
    %126 = vector.load %arg2[%c2_60, %c0_61, %c0_62] : memref<3x256x128xf32, #tpu.memory_space<vmem>>, vector<1x256x128xf32>
    %127 = vector.shape_cast %126 : vector<1x256x128xf32> to vector<256x128xf32>
    %cst_63 = arith.constant dense<0.000000e+00> : vector<32x128xf32>
    %128 = tpu.matmul %125, %127, %cst_63 {dimension_numbers = #tpu.dot_dimension_numbers<[1], [0], [0], [1], [0, 0, 1, 1], [], []>} : vector<32x256xf32>, vector<256x128xf32>, vector<32x128xf32> -> vector<32x128xf32>
    %129 = arith.addf %111, %128 : vector<32x128xf32>
    %c0_64 = arith.constant 0 : index
    %c0_65 = arith.constant 0 : index
    %130 = vector.load %arg7[%c0_64, %c0_65] : memref<128x8xf32, #tpu.memory_space<vmem>>, vector<128x8xf32>
    %c0_66 = arith.constant 0 : index
    %c0_67 = arith.constant 0 : index
    %131 = vector.load %arg8[%c0_66, %c0_67] : memref<8x128xf32, #tpu.memory_space<vmem>>, vector<8x128xf32>
    %c0_68 = arith.constant 0 : index
    %c0_69 = arith.constant 0 : index
    %132 = vector.load %arg9[%c0_68, %c0_69] : memref<2x8xf32, #tpu.memory_space<vmem>>, vector<1x8xf32>
    %c1_70 = arith.constant 1 : index
    %c0_71 = arith.constant 0 : index
    %133 = vector.load %arg9[%c1_70, %c0_71] : memref<2x8xf32, #tpu.memory_space<vmem>>, vector<1x8xf32>
    %cst_72 = arith.constant dense<0.000000e+00> : vector<128xf32>
    %134 = vector.multi_reduction <add>, %129, %cst_72 [0] : vector<32x128xf32> to vector<128xf32>
    %135 = vector.shape_cast %134 : vector<128xf32> to vector<1x128xf32>
    %cst_73 = arith.constant dense<0.000000e+00> : vector<1x8xf32>
    %136 = tpu.matmul %135, %130, %cst_73 {dimension_numbers = #tpu.dot_dimension_numbers<[1], [0], [0], [1], [0, 0, 1, 1], [], []>} : vector<1x128xf32>, vector<128x8xf32>, vector<1x8xf32> -> vector<1x8xf32>
    %cst_74 = arith.constant 0.001953125 : f32
    %137 = vector.broadcast %cst_74 : f32 to vector<1x8xf32>
    %138 = arith.mulf %136, %137 : vector<1x8xf32>
    %cst_75 = arith.constant dense<0.000000e+00> : vector<1x128xf32>
    %139 = tpu.matmul %138, %131, %cst_75 {dimension_numbers = #tpu.dot_dimension_numbers<[1], [0], [0], [1], [0, 0, 1, 1], [], []>} : vector<1x8xf32>, vector<8x128xf32>, vector<1x128xf32> -> vector<1x128xf32>
    %140 = vector.broadcast %139 : vector<1x128xf32> to vector<32x128xf32>
    %141 = arith.subf %129, %140 : vector<32x128xf32>
    %142 = arith.mulf %141, %141 : vector<32x128xf32>
    %cst_76 = arith.constant dense<0.000000e+00> : vector<128xf32>
    %143 = vector.multi_reduction <add>, %142, %cst_76 [0] : vector<32x128xf32> to vector<128xf32>
    %144 = vector.shape_cast %143 : vector<128xf32> to vector<1x128xf32>
    %cst_77 = arith.constant dense<0.000000e+00> : vector<1x8xf32>
    %145 = tpu.matmul %144, %130, %cst_77 {dimension_numbers = #tpu.dot_dimension_numbers<[1], [0], [0], [1], [0, 0, 1, 1], [], []>} : vector<1x128xf32>, vector<128x8xf32>, vector<1x8xf32> -> vector<1x8xf32>
    %cst_78 = arith.constant 0.001953125 : f32
    %146 = vector.broadcast %cst_78 : f32 to vector<1x8xf32>
    %147 = arith.mulf %145, %146 : vector<1x8xf32>
    %cst_79 = arith.constant 9.99999974E-6 : f32
    %148 = vector.broadcast %cst_79 : f32 to vector<1x8xf32>
    %149 = arith.addf %147, %148 : vector<1x8xf32>
    %150 = math.rsqrt %149 : vector<1x8xf32>
    %151 = arith.mulf %132, %150 : vector<1x8xf32>
    %cst_80 = arith.constant dense<0.000000e+00> : vector<1x128xf32>
    %152 = tpu.matmul %151, %131, %cst_80 {dimension_numbers = #tpu.dot_dimension_numbers<[1], [0], [0], [1], [0, 0, 1, 1], [], []>} : vector<1x8xf32>, vector<8x128xf32>, vector<1x128xf32> -> vector<1x128xf32>
    %cst_81 = arith.constant dense<0.000000e+00> : vector<1x128xf32>
    %153 = tpu.matmul %133, %131, %cst_81 {dimension_numbers = #tpu.dot_dimension_numbers<[1], [0], [0], [1], [0, 0, 1, 1], [], []>} : vector<1x8xf32>, vector<8x128xf32>, vector<1x128xf32> -> vector<1x128xf32>
    %154 = vector.broadcast %152 : vector<1x128xf32> to vector<32x128xf32>
    %155 = arith.mulf %141, %154 : vector<32x128xf32>
    %156 = vector.broadcast %153 : vector<1x128xf32> to vector<32x128xf32>
    %157 = arith.addf %155, %156 : vector<32x128xf32>
    %cst_82 = arith.constant 0.000000e+00 : f32
    %158 = vector.broadcast %cst_82 : f32 to vector<32x128xf32>
    %159 = arith.maximumf %157, %158 : vector<32x128xf32>
    %c0_83 = arith.constant 0 : index
    %c0_84 = arith.constant 0 : index
    %160 = vector.load %arg3[%c0_83, %c0_84] : memref<129x128xf32, #tpu.memory_space<vmem>>, vector<128x128xf32>
    %c128 = arith.constant 128 : index
    %c0_85 = arith.constant 0 : index
    %161 = vector.load %arg3[%c128, %c0_85] : memref<129x128xf32, #tpu.memory_space<vmem>>, vector<1x128xf32>
    %cst_86 = arith.constant dense<0.000000e+00> : vector<32x128xf32>
    %162 = tpu.matmul %159, %160, %cst_86 {dimension_numbers = #tpu.dot_dimension_numbers<[1], [0], [0], [1], [0, 0, 1, 1], [], []>} : vector<32x128xf32>, vector<128x128xf32>, vector<32x128xf32> -> vector<32x128xf32>
    %163 = vector.broadcast %161 : vector<1x128xf32> to vector<32x128xf32>
    %164 = arith.addf %162, %163 : vector<32x128xf32>
    %c0_87 = arith.constant 0 : index
    %c0_88 = arith.constant 0 : index
    %165 = vector.load %arg10[%c0_87, %c0_88] : memref<32x128xf32, #tpu.memory_space<vmem>>, vector<32x128xf32>
    tpu.vector_store %arg10[%c0_87, %c0_88], %164 {strides = array<i32>} : memref<32x128xf32, #tpu.memory_space<vmem>>, vector<32x128xf32>,
    return
  }
}

</mosaic_0001>

<bundles_post_ra>
// kernel: encoder_forward.1
= control target key start
LH: loop header
LB: loop body
LE: loop exit
PB: predicated region body
PF: predicated region fallthrough
CT: control target
= control target key end

     0   :  { %15 = vsyncpa [#allocation3], 0  ;;  %s1543_s16 = smov [#allocation2]   ;;  %s1544_s18 = smov 128   ;;  %s2259_s0 = inlined_call_operand.vmem [shape: f32[34,64], index: 0, kind: input, shape index: {}]   ;;  %s2260_s1 = inlined_call_operand.vmem [shape: f32[3,64,256], index: 1, kind: input, shape index: {}]   ;;  %s2261_s2 = inlined_call_operand.hbm [shape: f32[3,256,128], index: 2, kind: input, shape index: {}]   ;;  %s2262_s3 = inlined_call_operand.vmem [shape: f32[129,128], index: 3, kind: input, shape index: {}]   ;;  %s2263_s4 = inlined_call_operand.vmem [shape: f32[256,16], index: 4, kind: input, shape index: {}]   ;;  %s2264_s5 = inlined_call_operand.vmem [shape: f32[16,256], index: 5, kind: input, shape index: {}]   ;;  %s2265_s6 = inlined_call_operand.vmem [shape: f32[2,16], index: 6, kind: input, shape index: {}]   ;;  %s2266_s7 = inlined_call_operand.vmem [shape: f32[128,8], index: 7, kind: input, shape index: {}]   ;;  %s2267_s8 = inlined_call_operand.vmem [shape: f32[8,128], index: 8, kind: input, shape index: {}]   ;;  %s2268_s9 = inlined_call_operand.vmem [shape: f32[2,8], index: 9, kind: input, shape index: {}]   ;;  %s2269_s10 = inlined_call_operand.vmem [shape: f32[32,128], index: 10, kind: output, shape index: {}]  }
   0x1   :  { %s24_s15 = sshll.u32 %s2261_s2, 4  ;;  %s26_s17 = sshll.u32 %s1543_s16, 4  ;;  %s25_s15 = int_to_ptr.hbm [resolvable:$true] %s24_s15  ;;  %s27_s17 = int_to_ptr.vmem [resolvable:$true] %s26_s17 }
   0x2   :  { %s1545_s19 = smov 8  }
   0x3   :  { %32 = dma.hbm_to_vmem [thread:$0]  %s25_s15, 12288, %s27_s17, [#allocation3], %s1544_s18, %s1544_s18, %s1545_s19  }
   0x4   :  { %1541 = dma.done.wait [#allocation3], 12288  }
   0x5   :  { %1542 = vsyncadd [#allocation3], 4294955008  ;;  %v51_v0 = vlaneseq  ;;  %v1442_v2 = vld [vmem:[%s2260_s1 + $0xf0] sm:$0xff]  ;;  %v1440_v4 = vld [vmem:[%s2260_s1 + $0xe0] sm:$0xff]  ;;  %vm175_vm0 = vcmask 1046528   ;;  %vm185_vm2 = vcmask 523264  }
   0x6   :  { %v151_v3 = vld [vmem:[%s2260_s1 + $0x70] sm:$0xff]  ;;  %202 = vmatpush.msra.mxu0 %v1442_v2  ;;  %1501 = vmatpush.msra.mxu1 %v1442_v2  ;;  %v149_v5 = vld [vmem:[%s2260_s1 + $0x60] sm:$0xff]  ;;  %v1642_v13 = vld [vmem:[%s2259_s0 + $0x8] sm:$0xff]  ;;  %vm346_vm4 = vcmask 1045504   ;;  %vm556_vm7 = vcmask 130048   ;;  %vm811_vm11 = vcmask 1040384  }
   0x7   :  { %v1604_v1 = vshrl.u32 %v51_v0, 7  ;;  %272 = vmatpush.msra.mxu2 %v151_v3  ;;  %v1438_v6 = vld [vmem:[%s2260_s1 + $0xd0] sm:$0xff]  ;;  %v1436_v9 = vld [vmem:[%s2260_s1 + $0xc0] sm:$0xff]  ;;  %v1655_v16 = vld [vmem:[%s2259_s0 + $0x18] sm:$0xff]  ;;  %v177_v21 = vrot.slane %v1642_v13, 1  ;;  %vm1237_vm12 = vcmask 64512  }
   0x8   :  { %203 = vmatpush.msra.mxu0 %v1440_v4  ;;  %1502 = vmatpush.msra.mxu1 %v1440_v4  ;;  %v147_v7 = vld [vmem:[%s2260_s1 + $0x50] sm:$0xff]  ;;  %v145_v10 = vld [vmem:[%s2260_s1 + $0x40] sm:$0xff]  ;;  %v181_v24 = vrot.slane %v1655_v16, 1  ;;  %v1443_v30 = vld [vmem:[%s2260_s1 + $0xf8] sm:$0xff] }
   0x9   :  { %v60_v8 = vand.u32 15, %v1604_v1  ;;  %273 = vmatpush.msra.mxu2 %v149_v5  ;;  %v1434_v11 = vld [vmem:[%s2260_s1 + $0xb0] sm:$0xff]  ;;  %v1637_v12 = vld [vmem:[%s2259_s0] sm:$0xff]  ;;  %v152_v32 = vld [vmem:[%s2260_s1 + $0x78] sm:$0xff]  ;;  %v54_v34 = vadd.s32 16, %v1604_v1 }
   0xa   :  { %204 = vmatpush.msra.mxu0 %v1438_v6  ;;  %1503 = vmatpush.msra.mxu1 %v1438_v6  ;;  %v143_v14 = vld [vmem:[%s2260_s1 + $0x30] sm:$0xff]  ;;  %v1432_v18 = vld [vmem:[%s2260_s1 + $0xa0] sm:$0xff]  ;;  %v176_v20 = vrot.slane %v1637_v12, 1  ;;  %v1441_v35 = vld [vmem:[%s2260_s1 + $0xe8] sm:$0xff] }
   0xb   :  { %274 = vmatpush.msra.mxu2 %v147_v7  ;;  %v1650_v15 = vld [vmem:[%s2259_s0 + $0x10] sm:$0xff]  ;;  %v1657_v17 = vadd.s32 4294967295, %v60_v8  ;;  %v141_v19 = vld [vmem:[%s2260_s1 + $0x20] sm:$0xff]  ;;  %v150_v36 = vld [vmem:[%s2260_s1 + $0x68] sm:$0xff]  ;;  %v74_v40 = vand.u32 15, %v54_v34  ;;  %v53_v8 = vadd.s32 8, %v1604_v1 }
   0xc   :  { %205 = vmatpush.msra.mxu0 %v1436_v9  ;;  %1504 = vmatpush.msra.mxu1 %v1436_v9  ;;  %v1430_v22 = vld [vmem:[%s2260_s1 + $0x90] sm:$0xff]  ;;  %v179_v23 = vrot.slane %v1650_v15, 1  ;;  %v1428_v26 = vld [vmem:[%s2260_s1 + $0x80] sm:$0xff]  ;;  %v178_v28 = vsel %vm175_vm0, %v176_v20, %v177_v21  ;;  %v1439_v38 = vld [vmem:[%s2260_s1 + $0xd8] sm:$0xff]  ;;  %v347_v9 = vrot.slane %v1637_v12, 2 }
   0xd   :  { %275 = vmatpush.msra.mxu2 %v145_v10  ;;  %v139_v25 = vld [vmem:[%s2260_s1 + $0x10] sm:$0xff]  ;;  %vm113_vm1 = vcmp.ge.s32.totalorder %v1657_v17, 0  ;;  %v137_v27 = vld [vmem:[%s2260_s1] sm:$0xff]  ;;  %v148_v39 = vld [vmem:[%s2260_s1 + $0x58] sm:$0xff]  ;;  %v1734_v47 = vadd.s32 4294967295, %v74_v40  ;;  %v348_v10 = vrot.slane %v1642_v13, 2 }
   0xe   :  { %206 = vmatpush.msra.mxu0 %v1434_v11  ;;  %1505 = vmatpush.msra.mxu1 %v1434_v11  ;;  %v1684_v29 = vsel %vm175_vm0, %v179_v23, %v181_v24  ;;  %v133_v31 = vsel %vm113_vm1, %v1637_v12, 0.0  ;;  %v1698_v33 = vld [vmem:[%s2259_s0 + $0x20] sm:$0x3]  ;;  %v1437_v41 = vld [vmem:[%s2260_s1 + $0xc8] sm:$0xff]  ;;  %v180_v43 = vsel %vm175_vm0, %v177_v21, %v179_v23  ;;  %v1435_v45 = vld [vmem:[%s2260_s1 + $0xb8] sm:$0xff]  ;;  %v67_v11 = vand.u32 15, %v53_v8 }
   0xf   :  { %276 = vmatpush.msra.mxu2 %v143_v14  ;;  %v183_v37 = vrot.slane %v1698_v33, 1  ;;  %v146_v42 = vld [vmem:[%s2260_s1 + $0x48] sm:$0xff]  ;;  %v144_v46 = vld [vmem:[%s2260_s1 + $0x38] sm:$0xff]  ;;  %vm115_vm3 = vcmp.ge.s32.totalorder %v1734_v47, 0  ;;  %v1474_v55 = vld [vmem:[%s2260_s1 + $0x170] sm:$0xff]  ;;  %v349_v14 = vsel %vm346_vm4, %v347_v9, %v348_v10  ;;  %v352_v21 = vrot.slane %v1655_v16, 2 }
  0x10   :  { %207 = vmatpush.msra.mxu0 %v1432_v18  ;;  %1506 = vmatpush.msra.mxu1 %v1432_v18  ;;  %v1433_v48 = vld [vmem:[%s2260_s1 + $0xa8] sm:$0xff]  ;;  %v1431_v50 = vld [vmem:[%s2260_s1 + $0x98] sm:$0xff]  ;;  %v135_v54 = vsel %vm115_vm3, %v1650_v15, 0.0  ;;  %v1472_v57 = vld [vmem:[%s2260_s1 + $0x160] sm:$0xff]  ;;  %v1830_v18 = vadd.s32 1, %v67_v11 }
  0x11   :  { %277 = vmatpush.msra.mxu2 %v141_v19  ;;  %v1726_v44 = vsel %vm175_vm0, %v181_v24, %v183_v37  ;;  %v142_v49 = vld [vmem:[%s2260_s1 + $0x28] sm:$0xff]  ;;  %v140_v51 = vld [vmem:[%s2260_s1 + $0x18] sm:$0xff]  ;;  %v1470_v59 = vld [vmem:[%s2260_s1 + $0x150] sm:$0xff]  ;;  %v350_v19 = vrot.slane %v1650_v15, 2  ;;  %v354_v24 = vrot.slane %v1698_v33, 2 }
  0x12   :  { %208 = vmatpush.msra.mxu0 %v1430_v22  ;;  %1507 = vmatpush.msra.mxu1 %v1430_v22  ;;  %v1429_v52 = vld [vmem:[%s2260_s1 + $0x88] sm:$0xff]  ;;  %v1475_v56 = vld [vmem:[%s2260_s1 + $0x178] sm:$0xff]  ;;  %v1468_v61 = vld [vmem:[%s2260_s1 + $0x140] sm:$0xff]  ;;  %vm331_vm5 = vcmp.lt.s32.totalorder %v1830_v18, 16 }
  0x13   :  { %278 = vmatpush.msra.mxu2 %v139_v25  ;;  %v138_v53 = vld [vmem:[%s2260_s1 + $0x8] sm:$0xff]  ;;  %v1471_v60 = vld [vmem:[%s2260_s1 + $0x158] sm:$0xff]  ;;  %v1466_v63 = vld [vmem:[%s2260_s1 + $0x130] sm:$0xff]  ;;  %v351_v20 = vsel %vm346_vm4, %v348_v10, %v350_v19  ;;  %v353_v22 = vsel %vm346_vm4, %v350_v19, %v352_v21 }
  0x14   :  { %209 = vmatpush.msra.mxu0 %v1428_v26  ;;  %1508 = vmatpush.msra.mxu1 %v1428_v26  ;;  %v1473_v58 = vld [vmem:[%s2260_s1 + $0x168] sm:$0xff]  ;;  %v1467_v0 = vld [vmem:[%s2260_s1 + $0x138] sm:$0xff]  ;;  %v1464_v2 = vld [vmem:[%s2260_s1 + $0x120] sm:$0xff]  ;;  %v361_v12 = vsel %vm331_vm5, %v351_v20, 0.0 }
  0x15   :  { %279 = vmatpush.msra.mxu2 %v137_v27  ;;  %1444 = vmatmul.msk.f32.vlgmr.msra.gmra.mxu0 %vm185_vm2, %v178_v28  ;;  %v1469_v62 = vld [vmem:[%s2260_s1 + $0x148] sm:$0xff]  ;;  %v1462_v4 = vld [vmem:[%s2260_s1 + $0x110] sm:$0xff]  ;;  %v1460_v5 = vld [vmem:[%s2260_s1 + $0x100] sm:$0xff] }
  0x16   :  { %1446 = vmatmul.msk.f32.vlgmr.msra.gmra.mxu1 %vm185_vm2, %v1684_v29  ;;  %1452 = vmatmul.msk.f32.vlgmr.msra.gmra.mxu2 %vm185_vm2, %v133_v31  ;;  %v1465_v3 = vld [vmem:[%s2260_s1 + $0x128] sm:$0xff]  ;;  %v1463_v6 = vld [vmem:[%s2260_s1 + $0x118] sm:$0xff]  ;;  %v459_v9 = vld [vmem:[%s2263_s4] sm:$0xff] }
  0x17   :  { %231 = vmatpush.msrb.mxu1 %v1443_v30  ;;  %301 = vmatpush.msrb.mxu0 %v152_v32  ;;  %v1461_v7 = vld [vmem:[%s2260_s1 + $0x108] sm:$0xff]  ;;  %v474_v33 = vld [vmem:[%s2263_s4 + $0x78] sm:$0xff]  ;;  %v475_v10 = vld [vmem:[%s2263_s4 + $0x80] sm:$0xff] }
  0x18   :  { %v490_v34 = vld [vmem:[%s2263_s4 + $0xf8] sm:$0xff]  ;;  %515 = vmatpush.msrb.mxu2 %v474_v33  ;;  %v472_v37 = vld [vmem:[%s2263_s4 + $0x68] sm:$0xff]  ;;  %v1980_v19 = vld [vmem:[%s2264_s5 + $0x10] sm:$0xff] }
  0x19   :  { %232 = vmatpush.msrb.mxu1 %v1441_v35  ;;  %302 = vmatpush.msrb.mxu0 %v150_v36  ;;  %v473_v35 = vld [vmem:[%s2263_s4 + $0x70] sm:$0xff]  ;;  %v476_v8 = vld [vmem:[%s2263_s4 + $0x88] sm:$0xff]  ;;  %v494_v20 = vld [vmem:[%s2264_s5 + $0x18] sm:$0xff] }
  0x1a   :  { %535 = vmatpush.msra.mxu3 %v490_v34  ;;  %v489_v36 = vld [vmem:[%s2263_s4 + $0xf0] sm:$0xff]  ;;  %516 = vmatpush.msrb.mxu2 %v473_v35 }
  0x1b   :  { %233 = vmatpush.msrb.mxu1 %v1439_v38  ;;  %303 = vmatpush.msrb.mxu0 %v148_v39  ;;  %v488_v38 = vld [vmem:[%s2263_s4 + $0xe8] sm:$0xff]  ;;  %v471_v39 = vld [vmem:[%s2263_s4 + $0x60] sm:$0xff] }
  0x1c   :  { %536 = vmatpush.msra.mxu3 %v489_v36  ;;  %517 = vmatpush.msrb.mxu2 %v472_v37 }
  0x1d   :  { %234 = vmatpush.msrb.mxu1 %v1437_v41  ;;  %304 = vmatpush.msrb.mxu0 %v146_v42  ;;  %v487_v41 = vld [vmem:[%s2263_s4 + $0xe0] sm:$0xff] }
  0x1e   :  { %1445 = vmatmul.msk.f32.gmra.mxu0 %vm185_vm2, %v180_v43  ;;  %1447 = vmatmul.msk.f32.gmra.mxu1 %vm185_vm2, %v1726_v44 }
  0x1f   :  { %235 = vmatpush.msrb.mxu1 %v1435_v45  ;;  %1453 = vmatmul.msk.f32.gmra.mxu2 %vm185_vm2, %v1642_v13  ;;  %v469_v45 = vld [vmem:[%s2263_s4 + $0x50] sm:$0xff] }
  0x20   :  { %305 = vmatpush.msrb.mxu0 %v144_v46  ;;  %537 = vmatpush.msra.mxu3 %v488_v38  ;;  %v485_v46 = vld [vmem:[%s2263_s4 + $0xd0] sm:$0xff] }
  0x21   :  { %236 = vmatpush.msrb.mxu1 %v1433_v48  ;;  %518 = vmatpush.msrb.mxu2 %v471_v39  ;;  %v468_v48 = vld [vmem:[%s2263_s4 + $0x48] sm:$0xff] }
  0x22   :  { %306 = vmatpush.msrb.mxu0 %v142_v49  ;;  %538 = vmatpush.msra.mxu3 %v487_v41  ;;  %v484_v49 = vld [vmem:[%s2263_s4 + $0xc8] sm:$0xff] }
  0x23   :  { %237 = vmatpush.msrb.mxu1 %v1431_v50  ;;  %v467_v50 = vld [vmem:[%s2263_s4 + $0x40] sm:$0xff] }
  0x24   :  { %307 = vmatpush.msrb.mxu0 %v140_v51 }
  0x25   :  { %238 = vmatpush.msrb.mxu1 %v1429_v52 }
  0x26   :  { %308 = vmatpush.msrb.mxu0 %v138_v53  ;;  %1448 = vmatmul.msk.f32.vlgmr.msrb.gmra.mxu1 %vm185_vm2, %v178_v28  ;;  %v483_v53 = vld [vmem:[%s2263_s4 + $0xc0] sm:$0xff] }
  0x27   :  { %1454 = vmatmul.msk.f32.gmra.mxu2 %vm185_vm2, %v135_v54  ;;  %1456 = vmatmul.msk.f32.vlgmr.msrb.gmra.mxu0 %vm185_vm2, %v133_v31 }
  0x28   :  { %401 = vmatpush.msra.mxu0 %v1474_v55  ;;  %430 = vmatpush.msra.mxu1 %v1475_v56  ;;  %v466_v55 = vld [vmem:[%s2263_s4 + $0x38] sm:$0xff] }
  0x29   :  { %v482_v56 = vld [vmem:[%s2263_s4 + $0xb8] sm:$0xff] }
  0x2a   :  { %402 = vmatpush.msra.mxu0 %v1472_v57  ;;  %431 = vmatpush.msra.mxu1 %v1473_v58  ;;  %v465_v57 = vld [vmem:[%s2263_s4 + $0x30] sm:$0xff] }
  0x2b   :  { %v481_v58 = vld [vmem:[%s2263_s4 + $0xb0] sm:$0xff] }
  0x2c   :  { %403 = vmatpush.msra.mxu0 %v1470_v59  ;;  %432 = vmatpush.msra.mxu1 %v1471_v60  ;;  %v464_v59 = vld [vmem:[%s2263_s4 + $0x28] sm:$0xff] }
  0x2d   :  { %v480_v60 = vld [vmem:[%s2263_s4 + $0xa8] sm:$0xff] }
  0x2e   :  { %1449 = vmatmul.msk.f32.gmra.mxu1 %vm185_vm2, %v180_v43  ;;  %404 = vmatpush.msra.mxu0 %v1468_v61  ;;  %v470_v43 = vld [vmem:[%s2263_s4 + $0x58] sm:$0xff] }
  0x2f   :  { %1455 = vmatmul.msk.f32.gmra.mxu2 %vm185_vm2, %v1655_v16  ;;  %1457 = vmatmul.msk.f32.gmra.mxu0 %vm185_vm2, %v1642_v13  ;;  %v55_v13 = vadd.s32 24, %v1604_v1  ;;  %v355_v1 = vsel %vm346_vm4, %v352_v21, %v354_v24 }
  0x30   :  { %433 = vmatpush.msra.mxu1 %v1469_v62  ;;  %405 = vmatpush.msra.mxu0 %v1466_v63  ;;  %v463_v62 = vld [vmem:[%s2263_s4 + $0x20] sm:$0xff] }
  0x31   :  { %v81_v15 = vand.u32 15, %v55_v13  ;;  %519 = vmatpush.msrb.mxu2 %v470_v43  ;;  %v479_v63 = vld [vmem:[%s2263_s4 + $0xa0] sm:$0xff] }
  0x32   :  { %434 = vmatpush.msra.mxu1 %v1467_v0  ;;  %406 = vmatpush.msra.mxu0 %v1464_v2 }
  0x33   :  { %v1844_v23 = vadd.s32 1, %v81_v15  ;;  %520 = vmatpush.msrb.mxu2 %v469_v45 }
  0x34   :  { %435 = vmatpush.msra.mxu1 %v1465_v3  ;;  %407 = vmatpush.msra.mxu0 %v1462_v4  ;;  %v462_v3 = vld [vmem:[%s2263_s4 + $0x18] sm:$0xff] }
  0x35   :  { %vm333_vm6 = vcmp.lt.s32.totalorder %v1844_v23, 16  ;;  %521 = vmatpush.msrb.mxu2 %v468_v48  ;;  %v478_v4 = vld [vmem:[%s2263_s4 + $0x98] sm:$0xff]  ;;  %v1201_v23 = vld [vmem:[%s2266_s7 + $0x68] sm:$0xff] }
  0x36   :  { %1450 = vmatmul.msk.f32.gmra.mxu1 %vm185_vm2, %v1684_v29  ;;  %408 = vmatpush.msra.mxu0 %v1460_v5  ;;  %v363_v25 = vsel %vm333_vm6, %v355_v1, 0.0  ;;  %v461_v5 = vld [vmem:[%s2263_s4 + $0x10] sm:$0xff] }
  0x37   :  { %1458 = vmatmul.msk.f32.gmra.mxu0 %vm185_vm2, %v135_v54  ;;  %436 = vmatpush.msra.mxu1 %v1463_v6  ;;  %v477_v6 = vld [vmem:[%s2263_s4 + $0x90] sm:$0xff] }
  0x38   :  { %636 = vmatpush.msrb.mxu0 %v474_v33  ;;  %522 = vmatpush.msrb.mxu2 %v467_v50 }
  0x39   :  { %437 = vmatpush.msra.mxu1 %v1461_v7  ;;  %v460_v7 = vld [vmem:[%s2263_s4 + $0x8] sm:$0xff] }
  0x3a   :  { %637 = vmatpush.msrb.mxu0 %v473_v35  ;;  %523 = vmatpush.msrb.mxu2 %v466_v55 }
  0x3b   :  { %656 = vmatpush.msrb.mxu1 %v490_v34 }
  0x3c   :  { %638 = vmatpush.msrb.mxu0 %v472_v37  ;;  %524 = vmatpush.msrb.mxu2 %v465_v57 }
  0x3d   :  { %657 = vmatpush.msrb.mxu1 %v489_v36 }
  0x3e   :  { %1451 = vmatmul.msk.f32.gmra.mxu1 %vm185_vm2, %v1726_v44  ;;  %v486_v44 = vld [vmem:[%s2263_s4 + $0xd8] sm:$0xff]  ;;  %639 = vmatpush.msrb.mxu0 %v471_v39 }
  0x3f   :  { %1459 = vmatmul.msk.f32.gmra.mxu0 %vm185_vm2, %v1655_v16  ;;  %658 = vmatpush.msrb.mxu1 %v488_v38 }
  0x40   :  { %539 = vmatpush.msra.mxu3 %v486_v44  ;;  %640 = vmatpush.msrb.mxu0 %v470_v43 }
  0x41   :  { %659 = vmatpush.msrb.mxu1 %v487_v41  ;;  %525 = vmatpush.msrb.mxu2 %v464_v59 }
  0x42   :  { %540 = vmatpush.msra.mxu3 %v485_v46  ;;  %641 = vmatpush.msrb.mxu0 %v469_v45 }
  0x43   :  { %660 = vmatpush.msrb.mxu1 %v486_v44  ;;  %526 = vmatpush.msrb.mxu2 %v463_v62 }
  0x44   :  { %541 = vmatpush.msra.mxu3 %v484_v49  ;;  %642 = vmatpush.msrb.mxu0 %v468_v48 }
  0x45   :  { %661 = vmatpush.msrb.mxu1 %v485_v46  ;;  %527 = vmatpush.msrb.mxu2 %v462_v3 }
  0x46   :  { %1480 = vmatmul.msk.f32.vlgmr.msra.gmra.mxu1 %vm185_vm2, %v349_v14  ;;  %542 = vmatpush.msra.mxu3 %v483_v53 }
  0x47   :  { %1476 = vmatmul.msk.f32.vlgmr.msra.gmra.mxu0 %vm185_vm2, %v349_v14  ;;  %662 = vmatpush.msrb.mxu1 %v484_v49 }
  0x48   :  { %643 = vmatpush.msrb.mxu0 %v467_v50  ;;  %543 = vmatpush.msra.mxu3 %v482_v56 }
  0x49   :  { %663 = vmatpush.msrb.mxu1 %v483_v53  ;;  %528 = vmatpush.msrb.mxu2 %v461_v5 }
  0x4a   :  { %644 = vmatpush.msrb.mxu0 %v466_v55  ;;  %544 = vmatpush.msra.mxu3 %v481_v58 }
  0x4b   :  { %664 = vmatpush.msrb.mxu1 %v482_v56  ;;  %529 = vmatpush.msrb.mxu2 %v460_v7 }
  0x4c   :  { %645 = vmatpush.msrb.mxu0 %v465_v57  ;;  %545 = vmatpush.msra.mxu3 %v480_v60 }
  0x4d   :  { %665 = vmatpush.msrb.mxu1 %v481_v58  ;;  %530 = vmatpush.msrb.mxu2 %v459_v9  ;;  %v491_v58 = vld [vmem:[%s2264_s5] sm:$0xff] }
  0x4e   :  { %1481 = vmatmul.msk.f32.gmra.mxu1 %vm185_vm2, %v361_v12  ;;  %646 = vmatpush.msrb.mxu0 %v464_v59  ;;  %v492_v59 = vld [vmem:[%s2264_s5 + $0x8] sm:$0xff] }
  0x4f   :  { %1477 = vmatmul.msk.f32.gmra.mxu0 %vm185_vm2, %v361_v12  ;;  %666 = vmatpush.msrb.mxu1 %v480_v60 }
  0x50   :  { %546 = vmatpush.msra.mxu3 %v479_v63  ;;  %647 = vmatpush.msrb.mxu0 %v463_v62 }
  0x51   :  { %667 = vmatpush.msrb.mxu1 %v479_v63  ;;  %574 = vmatpush.msra.mxu2 %v1980_v19 }
  0x52   :  { %547 = vmatpush.msra.mxu3 %v478_v4  ;;  %648 = vmatpush.msrb.mxu0 %v462_v3 }
  0x53   :  { %668 = vmatpush.msrb.mxu1 %v478_v4  ;;  %575 = vmatpush.msra.mxu2 %v491_v58 }
  0x54   :  { %548 = vmatpush.msra.mxu3 %v477_v6  ;;  %649 = vmatpush.msrb.mxu0 %v461_v5 }
  0x55   :  { %669 = vmatpush.msrb.mxu1 %v477_v6 }
  0x56   :  { %1482 = vmatmul.msk.f32.gmra.mxu1 %vm185_vm2, %v353_v22  ;;  %549 = vmatpush.msra.mxu3 %v476_v8 }
  0x57   :  { %1478 = vmatmul.msk.f32.gmra.mxu0 %vm185_vm2, %v353_v22  ;;  %670 = vmatpush.msrb.mxu1 %v476_v8 }
  0x58   :  { %650 = vmatpush.msrb.mxu0 %v460_v7  ;;  %550 = vmatpush.msra.mxu3 %v475_v10 }
  0x59   :  { %671 = vmatpush.msrb.mxu1 %v475_v10 }
  0x5a   :  { %651 = vmatpush.msrb.mxu0 %v459_v9  ;;  %594 = vmatpush.msrb.mxu3 %v494_v20 }
  0x5c   :  { %595 = vmatpush.msrb.mxu3 %v492_v59 }
  0x5e   :  { %1483 = vmatmul.msk.f32.gmra.mxu1 %vm185_vm2, %v363_v25 }
  0x5f   :  { %1479 = vmatmul.msk.f32.gmra.mxu0 %vm185_vm2, %v363_v25 }
  0x92   :  { %v1855_v16 = vpop.f32.mrf.mxu0 }
  0x93   :  { %v1857_v26 = vpop.f32.mrf.mxu1 }
  0x99   :  { %v1920_v51 = vpop.f32.mrf.mxu2 }
  0x9a   :  { %v282_v33 = vadd.f32 %v1920_v51, %v1855_v16 }
  0x9b   :  { %v1859_v27 = vpop.f32.mrf.mxu0  ;;  %v1861_v28 = vpop.f32.mrf.mxu1 }
  0xa2   :  { %v284_v0 = vpop.f32.mrf.mxu2 }
  0xa3   :  { %v1863_v29 = vpop.f32.mrf.mxu1  ;;  %v285_v22 = vadd.f32 %v284_v0, %v1859_v27 }
  0xa4   :  { %v1865_v30 = vpop.f32.mrf.mxu0 }
  0xa5   :  { %v311_v24 = vadd.f32 %v1865_v30, %v1863_v29 }
  0xaa   :  { %v287_v12 = vpop.f32.mrf.mxu2 }
  0xab   :  { %v1867_v31 = vpop.f32.mrf.mxu1  ;;  %v288_v34 = vadd.f32 %v287_v12, %v1857_v26 }
  0xac   :  { %v1869_v32 = vpop.f32.mrf.mxu0 }
  0xad   :  { %v314_v21 = vadd.f32 %v1869_v32, %v1867_v31 }
  0xb2   :  { %v290_v36 = vpop.f32.mrf.mxu2 }
  0xb3   :  { %v1892_v40 = vpop.f32.mrf.mxu1  ;;  %v291_v29 = vadd.f32 %v290_v36, %v1861_v28 }
  0xb4   :  { %v1897_v42 = vpop.f32.mrf.mxu0 }
  0xb5   :  { %v317_v1 = vadd.f32 %v1897_v42, %v1892_v40 }
  0xbb   :  { %v1922_v52 = vpop.f32.mrf.mxu1 }
  0xbc   :  { %v1927_v54 = vpop.f32.mrf.mxu0 }
  0xbd   :  { %v320_v27 = vadd.f32 %v1927_v54, %v1922_v52 }
  0xc3   :  { %v439_v61 = vpop.f32.mrf.mxu1 }
  0xc4   :  { %v410_v2 = vpop.f32.mrf.mxu0  ;;  %v452_v37 = vadd.f32 %v439_v61, %v311_v24 }
  0xc5   :  { %v451_v31 = vadd.f32 %v410_v2, %v282_v33 }
  0xcb   :  { %v442_v11 = vpop.f32.mrf.mxu1 }
  0xcc   :  { %v413_v14 = vpop.f32.mrf.mxu0  ;;  %v454_v25 = vadd.f32 %v442_v11, %v314_v21 }
  0xcd   :  { %v453_v35 = vadd.f32 %v413_v14, %v285_v22 }
  0xce   :  { %v506_v39 = vadd.f32 %v454_v25, %v452_v37 }
  0xcf   :  { %v497_v30 = vadd.f32 %v453_v35, %v451_v31 }
  0xd3   :  { %v445_v13 = vpop.f32.mrf.mxu1 }
  0xd4   :  { %v416_v15 = vpop.f32.mrf.mxu0  ;;  %v456_v38 = vadd.f32 %v445_v13, %v317_v1 }
  0xd5   :  { %v455_v32 = vadd.f32 %v416_v15, %v288_v34 }
  0xd6   :  { %v507_v41 = vadd.f32 %v506_v39, %v456_v38 }
  0xd7   :  { %v498_v16 = vadd.f32 %v497_v30, %v455_v32 }
  0xdb   :  { %v448_v40 = vpop.f32.mrf.mxu1 }
  0xdc   :  { %v419_v42 = vpop.f32.mrf.mxu0  ;;  %v458_v43 = vadd.f32 %v448_v40, %v320_v27 }
  0xdd   :  { %v457_v44 = vadd.f32 %v419_v42, %v291_v29 }
  0xde   :  { %v508_v26 = vadd.f32 %v507_v41, %v458_v43 }
  0xdf   :  { %v499_v45 = vadd.f32 %v498_v16, %v457_v44 }
  0xe0   :  { %v509_v46 = vrot.slane %v508_v26, 4 }
  0xe1   :  { %v500_v48 = vrot.slane %v499_v45, 4 }
  0xe2   :  { %v510_v49 = vadd.f32 %v509_v46, %v508_v26  ;;  %v863_v46 = vld [vmem:[#allocation2 + $0x78] sm:$0xff] }
  0xe3   :  { %v501_v50 = vadd.f32 %v500_v48, %v499_v45  ;;  %v879_v48 = vld [vmem:[#allocation2 + $0xf8] sm:$0xff]  ;;  %1001 = vmatpush.msra.mxu0 %v863_v46  ;;  %v903_v46 = vld [vmem:[#allocation2 + $0x1b0] sm:$0xff] }
  0xe4   :  { %v511_v51 = vrot.slane %v510_v49, 2  ;;  %1030 = vmatpush.msra.mxu1 %v879_v48  ;;  %v852_v48 = vld [vmem:[#allocation2 + $0x20] sm:$0xff] }
  0xe5   :  { %v502_v53 = vrot.slane %v501_v50, 2 }
  0xe6   :  { %v512_v55 = vadd.f32 %v511_v51, %v510_v49  ;;  %v862_v49 = vld [vmem:[#allocation2 + $0x70] sm:$0xff] }
  0xe7   :  { %v503_v52 = vadd.f32 %v502_v53, %v501_v50  ;;  %v878_v50 = vld [vmem:[#allocation2 + $0xf0] sm:$0xff]  ;;  %v861_v53 = vld [vmem:[#allocation2 + $0x68] sm:$0xff]  ;;  %1002 = vmatpush.msra.mxu0 %v862_v49  ;;  %v868_v49 = vld [vmem:[#allocation2 + $0xa0] sm:$0xff] }
  0xe8   :  { %v513_v54 = vrot.slane %v512_v55, 1  ;;  %1031 = vmatpush.msra.mxu1 %v878_v50  ;;  %v886_v50 = vld [vmem:[#allocation2 + $0x128] sm:$0xff] }
  0xe9   :  { %v504_v56 = vrot.slane %v503_v52, 1  ;;  %1003 = vmatpush.msra.mxu0 %v861_v53  ;;  %v851_v53 = vld [vmem:[#allocation2 + $0x18] sm:$0xff] }
  0xea   :  { %v514_v28 = vadd.f32 %v513_v54, %v512_v55  ;;  %v877_v55 = vld [vmem:[#allocation2 + $0xe8] sm:$0xff]  ;;  %v876_v54 = vld [vmem:[#allocation2 + $0xe0] sm:$0xff] }
  0xeb   :  { %v505_v57 = vadd.f32 %v504_v56, %v503_v52  ;;  %v860_v52 = vld [vmem:[#allocation2 + $0x60] sm:$0xff]  ;;  %1032 = vmatpush.msra.mxu1 %v877_v55  ;;  %v859_v56 = vld [vmem:[#allocation2 + $0x58] sm:$0xff] }
  0xec   :  { %551 = vmatmul.f32.vlgmr.msra.gmra.mxu3 %v514_v28  ;;  %v875_v28 = vld [vmem:[#allocation2 + $0xd8] sm:$0xff]  ;;  %1004 = vmatpush.msra.mxu0 %v860_v52  ;;  %v885_v52 = vld [vmem:[#allocation2 + $0x120] sm:$0xff] }
  0xed   :  { %531 = vmatmul.f32.vlgmr.msrb.gmra.mxu2 %v505_v57  ;;  %726 = vmatpush.msra.mxu3 %v494_v20  ;;  %v858_v57 = vld [vmem:[#allocation2 + $0x50] sm:$0xff]  ;;  %v867_v55 = vld [vmem:[#allocation2 + $0x98] sm:$0xff] }
  0xee   :  { %706 = vmatpush.msrb.mxu2 %v1980_v19  ;;  %1033 = vmatpush.msra.mxu1 %v876_v54  ;;  %v901_v54 = vld [vmem:[#allocation2 + $0x1a0] sm:$0xff] }
  0xef   :  { %727 = vmatpush.msra.mxu3 %v492_v59  ;;  %1005 = vmatpush.msra.mxu0 %v859_v56  ;;  %v850_v56 = vld [vmem:[#allocation2 + $0x10] sm:$0xff] }
  0xf0   :  { %707 = vmatpush.msrb.mxu2 %v491_v58  ;;  %1034 = vmatpush.msra.mxu1 %v875_v28  ;;  %v866_v28 = vld [vmem:[#allocation2 + $0x90] sm:$0xff] }
  0xf1   :  { %1006 = vmatpush.msra.mxu0 %v858_v57  ;;  %v884_v57 = vld [vmem:[#allocation2 + $0x118] sm:$0xff] }
 0x16f   :  { %v552_v60 = vpop.f32.mrf.mxu3 }
 0x170   :  { %v532_v61 = vpop.f32.mrf.mxu2 }
 0x171   :  { %v553_v62 = vadd.f32 %v552_v60, %v532_v61  ;;  %v857_v60 = vld [vmem:[#allocation2 + $0x48] sm:$0xff] }
 0x172   :  { %v873_v61 = vld [vmem:[#allocation2 + $0xc8] sm:$0xff]  ;;  %1007 = vmatpush.msra.mxu0 %v857_v60 }
 0x173   :  { %v555_v63 = vmul.f32 0.001953125, %v553_v62  ;;  %v865_v60 = vld [vmem:[#allocation2 + $0x88] sm:$0xff] }
 0x175   :  { %1484 = vmatmul.msk.f32.vlgmr.msra.gmra.mxu2 %vm556_vm7, %v555_v63  ;;  %1485 = vmatmul.msk.f32.vlgmr.msrb.gmra.mxu3 %vm556_vm7, %v555_v63 }
 0x176   :  { %749 = vmatpush.msra.mxu2 %v1980_v19  ;;  %769 = vmatpush.msrb.mxu3 %v494_v20 }
 0x178   :  { %750 = vmatpush.msra.mxu2 %v491_v58  ;;  %770 = vmatpush.msrb.mxu3 %v492_v59  ;;  %v874_v58 = vld [vmem:[#allocation2 + $0xd0] sm:$0xff] }
 0x179   :  { %1035 = vmatpush.msra.mxu1 %v874_v58  ;;  %v900_v58 = vld [vmem:[#allocation2 + $0x198] sm:$0xff] }
 0x17b   :  { %1036 = vmatpush.msra.mxu1 %v873_v61  ;;  %v883_v61 = vld [vmem:[#allocation2 + $0x110] sm:$0xff] }
 0x1f8   :  { %v577_v0 = vpop.f32.mrf.mxu2  ;;  %v597_v2 = vpop.f32.mrf.mxu3 }
 0x1f9   :  { %v600_v3 = vperm.slane %v577_v0, 0  ;;  %v601_v4 = vperm.slane %v597_v2, 0 }
 0x1fb   :  { %v2009_v5 = vsub.f32 %v451_v31, %v600_v3  ;;  %v2011_v6 = vsub.f32 %v453_v35, %v600_v3  ;;  %v2013_v7 = vsub.f32 %v455_v32, %v600_v3  ;;  %v2015_v8 = vsub.f32 %v452_v37, %v601_v4 }
 0x1fc   :  { %v2017_v9 = vsub.f32 %v454_v25, %v601_v4  ;;  %v2019_v10 = vsub.f32 %v456_v38, %v601_v4  ;;  %v2021_v11 = vsub.f32 %v457_v44, %v600_v3  ;;  %v2027_v20 = vsub.f32 %v458_v43, %v601_v4  ;;  %v495_v3 = vld [vmem:[%s2265_s6] sm:$0x1] }
 0x1fd   :  { %v610_v14 = vmul.f32 %v2009_v5, %v2009_v5  ;;  %v612_v19 = vmul.f32 %v2011_v6, %v2011_v6  ;;  %v611_v12 = vmul.f32 %v2015_v8, %v2015_v8  ;;  %v614_v21 = vmul.f32 %v2013_v7, %v2013_v7 }
 0x1fe   :  { %v613_v13 = vmul.f32 %v2017_v9, %v2017_v9  ;;  %v615_v22 = vmul.f32 %v2019_v10, %v2019_v10  ;;  %v616_v1 = vmul.f32 %v2021_v11, %v2021_v11  ;;  %v617_v33 = vmul.f32 %v2027_v20, %v2027_v20 }
 0x1ff   :  { %v618_v15 = vadd.f32 %v612_v19, %v610_v14 }
 0x200   :  { %v627_v24 = vadd.f32 %v613_v13, %v611_v12  ;;  %v896_v12 = vld [vmem:[#allocation2 + $0x178] sm:$0xff] }
 0x201   :  { %v619_v25 = vadd.f32 %v618_v15, %v614_v21  ;;  %v912_v13 = vld [vmem:[#allocation2 + $0x1f8] sm:$0xff]  ;;  %v895_v21 = vld [vmem:[#allocation2 + $0x170] sm:$0xff] }
 0x202   :  { %v628_v34 = vadd.f32 %v627_v24, %v615_v22  ;;  %v911_v15 = vld [vmem:[#allocation2 + $0x1f0] sm:$0xff]  ;;  %v894_v22 = vld [vmem:[#allocation2 + $0x168] sm:$0xff] }
 0x203   :  { %v620_v35 = vadd.f32 %v619_v25, %v616_v1  ;;  %v910_v24 = vld [vmem:[#allocation2 + $0x1e8] sm:$0xff]  ;;  %v893_v1 = vld [vmem:[#allocation2 + $0x160] sm:$0xff] }
 0x204   :  { %v629_v36 = vadd.f32 %v628_v34, %v617_v33  ;;  %v909_v25 = vld [vmem:[#allocation2 + $0x1e0] sm:$0xff]  ;;  %v892_v34 = vld [vmem:[#allocation2 + $0x158] sm:$0xff] }
 0x205   :  { %v621_v37 = vrot.slane %v620_v35, 4  ;;  %v496_v33 = vld [vmem:[%s2265_s6 + $0x1] sm:$0x1] }
 0x206   :  { %v630_v38 = vrot.slane %v629_v36, 4 }
 0x207   :  { %v622_v31 = vadd.f32 %v621_v37, %v620_v35  ;;  %v908_v35 = vld [vmem:[#allocation2 + $0x1d8] sm:$0xff]  ;;  %v907_v37 = vld [vmem:[#allocation2 + $0x1d0] sm:$0xff] }
 0x208   :  { %v631_v32 = vadd.f32 %v630_v38, %v629_v36  ;;  %v891_v36 = vld [vmem:[#allocation2 + $0x150] sm:$0xff]  ;;  %v856_v38 = vld [vmem:[#allocation2 + $0x40] sm:$0xff] }
 0x209   :  { %v623_v27 = vrot.slane %v622_v31, 2  ;;  %1008 = vmatpush.msra.mxu0 %v856_v38  ;;  %v1103_v38 = vld [vmem:[#allocation2 + $0x248] sm:$0xff] }
 0x20a   :  { %v632_v39 = vrot.slane %v631_v32, 2 }
 0x20b   :  { %v624_v29 = vadd.f32 %v623_v27, %v622_v31  ;;  %v872_v31 = vld [vmem:[#allocation2 + $0xc0] sm:$0xff]  ;;  %v906_v27 = vld [vmem:[#allocation2 + $0x1c8] sm:$0xff] }
 0x20c   :  { %v633_v30 = vadd.f32 %v632_v39, %v631_v32  ;;  %1037 = vmatpush.msra.mxu1 %v872_v31  ;;  %v890_v32 = vld [vmem:[#allocation2 + $0x148] sm:$0xff]  ;;  %v855_v39 = vld [vmem:[#allocation2 + $0x38] sm:$0xff] }
 0x20d   :  { %v625_v40 = vrot.slane %v624_v29, 1  ;;  %1009 = vmatpush.msra.mxu0 %v855_v39  ;;  %v1119_v31 = vld [vmem:[#allocation2 + $0x2c8] sm:$0xff] }
 0x20e   :  { %v634_v41 = vrot.slane %v633_v30, 1 }
 0x20f   :  { %v626_v42 = vadd.f32 %v625_v40, %v624_v29  ;;  %v871_v29 = vld [vmem:[#allocation2 + $0xb8] sm:$0xff]  ;;  %v905_v40 = vld [vmem:[#allocation2 + $0x1c0] sm:$0xff] }
 0x210   :  { %v635_v43 = vadd.f32 %v634_v41, %v633_v30  ;;  %1038 = vmatpush.msra.mxu1 %v871_v29  ;;  %v889_v30 = vld [vmem:[#allocation2 + $0x140] sm:$0xff]  ;;  %v854_v41 = vld [vmem:[#allocation2 + $0x30] sm:$0xff] }
 0x211   :  { %652 = vmatmul.f32.vlgmr.msrb.gmra.mxu0 %v626_v42  ;;  %v870_v42 = vld [vmem:[#allocation2 + $0xb0] sm:$0xff] }
 0x212   :  { %672 = vmatmul.f32.vlgmr.msrb.gmra.mxu1 %v635_v43  ;;  %v888_v43 = vld [vmem:[#allocation2 + $0x138] sm:$0xff]  ;;  %1010 = vmatpush.msra.mxu0 %v854_v41  ;;  %v1100_v41 = vld [vmem:[#allocation2 + $0x230] sm:$0xff] }
 0x213   :  { %1039 = vmatpush.msra.mxu1 %v870_v42  ;;  %v1116_v42 = vld [vmem:[#allocation2 + $0x2b0] sm:$0xff] }
 0x28e   :  { %v653_v16 = vpop.f32.mrf.mxu0 }
 0x28f   :  { %v673_v44 = vpop.f32.mrf.mxu1 }
 0x290   :  { %v674_v26 = vadd.f32 %v673_v44, %v653_v16  ;;  %v904_v16 = vld [vmem:[#allocation2 + $0x1b8] sm:$0xff]  ;;  %v853_v44 = vld [vmem:[#allocation2 + $0x28] sm:$0xff] }
 0x291   :  { %1011 = vmatpush.msra.mxu0 %v853_v44 }
 0x292   :  { %v676_v45 = vmul.f32 0.001953125, %v674_v26  ;;  %v869_v26 = vld [vmem:[#allocation2 + $0xa8] sm:$0xff] }
 0x293   :  { %1040 = vmatpush.msra.mxu1 %v869_v26  ;;  %1012 = vmatpush.msra.mxu0 %v852_v48  ;;  %v1099_v26 = vld [vmem:[#allocation2 + $0x228] sm:$0xff] }
 0x294   :  { %v677_v51 = vadd.f32 1e-05, %v676_v45  ;;  %v887_v45 = vld [vmem:[#allocation2 + $0x130] sm:$0xff] }
 0x295   :  { %1041 = vmatpush.msra.mxu1 %v868_v49  ;;  %1013 = vmatpush.msra.mxu0 %v851_v53 }
 0x296   :  { %1513 = vrsqrt.f32 %v677_v51  ;;  %vm684_vm9 = vweird.f32 %v677_v51 }
 0x297   :  { %1042 = vmatpush.msra.mxu1 %v867_v55  ;;  %1014 = vmatpush.msra.mxu0 %v850_v56  ;;  %v1098_v56 = vld [vmem:[#allocation2 + $0x220] sm:$0xff] }
 0x299   :  { %1043 = vmatpush.msra.mxu1 %v866_v28  ;;  %v1114_v28 = vld [vmem:[#allocation2 + $0x2a0] sm:$0xff] }
 0x29b   :  { %1044 = vmatpush.msra.mxu1 %v865_v60 }
 0x29c   :  { %v1514_v59 = vpop.eup %1513 }
 0x29d   :  { %v679_v62 = vmul.f32 %v1514_v59, %v677_v51  ;;  %vm685_vm8 = vweird.f32 %v1514_v59  ;;  %v902_v51 = vld [vmem:[#allocation2 + $0x1a8] sm:$0xff] }
 0x29e   :  { %vm686_vm10 = vmor %vm684_vm9, %vm685_vm8 }
 0x29f   :  { %v680_v63 = vmul.f32 %v1514_v59, %v679_v62  ;;  %v899_v62 = vld [vmem:[#allocation2 + $0x190] sm:$0xff] }
 0x2a1   :  { %v681_v0 = vmul.f32 0.5, %v680_v63  ;;  %v848_v63 = vld [vmem:[#allocation2] sm:$0xff] }
 0x2a3   :  { %v682_v2 = vsub.f32 1.5, %v681_v0  ;;  %v864_v0 = vld [vmem:[#allocation2 + $0x80] sm:$0xff] }
 0x2a4   :  { %1045 = vmatpush.msra.mxu1 %v864_v0  ;;  %v1113_v0 = vld [vmem:[#allocation2 + $0x298] sm:$0xff] }
 0x2a5   :  { %v683_v4 = vmul.f32 %v1514_v59, %v682_v2  ;;  %v882_v2 = vld [vmem:[#allocation2 + $0x108] sm:$0xff] }
 0x2a7   :  { %v687_v14 = vsel %vm686_vm10, %v1514_v59, %v683_v4  ;;  %v849_v59 = vld [vmem:[#allocation2 + $0x8] sm:$0xff]  ;;  %v881_v4 = vld [vmem:[#allocation2 + $0x100] sm:$0xff] }
 0x2a8   :  { %v688_v19 = vmul.f32 %v687_v14, %v495_v3  ;;  %1015 = vmatpush.msra.mxu0 %v849_v59  ;;  %v898_v3 = vld [vmem:[#allocation2 + $0x188] sm:$0xff]  ;;  %v897_v14 = vld [vmem:[#allocation2 + $0x180] sm:$0xff] }
 0x2aa   :  { %1486 = vmatmul.msk.f32.vlgmr.msrb.gmra.mxu2 %vm556_vm7, %v688_v19  ;;  %1487 = vmatmul.msk.f32.vlgmr.msra.gmra.mxu3 %vm556_vm7, %v688_v19  ;;  %v1109_v19 = vld [vmem:[#allocation2 + $0x278] sm:$0xff] }
 0x2ab   :  { %943 = vmatpush.msrb.mxu2 %v896_v12  ;;  %972 = vmatpush.msra.mxu3 %v912_v13  ;;  %v1125_v12 = vld [vmem:[#allocation2 + $0x2f8] sm:$0xff]  ;;  %v1108_v13 = vld [vmem:[#allocation2 + $0x270] sm:$0xff] }
 0x2ac   :  { %1016 = vmatpush.msra.mxu0 %v848_v63  ;;  %v1097_v63 = vld [vmem:[#allocation2 + $0x218] sm:$0xff] }
 0x2ad   :  { %944 = vmatpush.msrb.mxu2 %v895_v21  ;;  %973 = vmatpush.msra.mxu3 %v911_v15  ;;  %v1124_v21 = vld [vmem:[#allocation2 + $0x2f0] sm:$0xff]  ;;  %v1107_v15 = vld [vmem:[#allocation2 + $0x268] sm:$0xff] }
 0x2af   :  { %945 = vmatpush.msrb.mxu2 %v894_v22  ;;  %974 = vmatpush.msra.mxu3 %v910_v24  ;;  %v1123_v22 = vld [vmem:[#allocation2 + $0x2e8] sm:$0xff]  ;;  %v1106_v24 = vld [vmem:[#allocation2 + $0x260] sm:$0xff] }
 0x2b1   :  { %946 = vmatpush.msrb.mxu2 %v893_v1  ;;  %975 = vmatpush.msra.mxu3 %v909_v25  ;;  %v1122_v1 = vld [vmem:[#allocation2 + $0x2e0] sm:$0xff]  ;;  %v1105_v25 = vld [vmem:[#allocation2 + $0x258] sm:$0xff] }
 0x2b2   :  { %1488 = vmatmul.msk.f32.vlgmr.msra.gmra.mxu2 %vm556_vm7, %v496_v33  ;;  %1489 = vmatmul.msk.f32.vlgmr.msrb.gmra.mxu3 %vm556_vm7, %v496_v33  ;;  %v1121_v33 = vld [vmem:[#allocation2 + $0x2d8] sm:$0xff] }
 0x2b3   :  { %947 = vmatpush.msrb.mxu2 %v892_v34  ;;  %976 = vmatpush.msra.mxu3 %v908_v35  ;;  %v1104_v34 = vld [vmem:[#allocation2 + $0x250] sm:$0xff] }
 0x2b4   :  { %v1120_v35 = vld [vmem:[#allocation2 + $0x2d0] sm:$0xff] }
 0x2b5   :  { %948 = vmatpush.msrb.mxu2 %v891_v36  ;;  %977 = vmatpush.msra.mxu3 %v907_v37 }
 0x2b7   :  { %949 = vmatpush.msrb.mxu2 %v890_v32  ;;  %978 = vmatpush.msra.mxu3 %v906_v27  ;;  %v1102_v32 = vld [vmem:[#allocation2 + $0x240] sm:$0xff] }
 0x2b8   :  { %v1118_v27 = vld [vmem:[#allocation2 + $0x2c0] sm:$0xff] }
 0x2b9   :  { %950 = vmatpush.msrb.mxu2 %v889_v30  ;;  %979 = vmatpush.msra.mxu3 %v905_v40  ;;  %v1101_v30 = vld [vmem:[#allocation2 + $0x238] sm:$0xff] }
 0x2ba   :  { %v1117_v40 = vld [vmem:[#allocation2 + $0x2b8] sm:$0xff] }
 0x2bb   :  { %951 = vmatpush.msrb.mxu2 %v888_v43  ;;  %980 = vmatpush.msra.mxu3 %v904_v16 }
 0x2bd   :  { %952 = vmatpush.msrb.mxu2 %v887_v45  ;;  %981 = vmatpush.msra.mxu3 %v903_v46 }
 0x2bf   :  { %953 = vmatpush.msrb.mxu2 %v886_v50  ;;  %982 = vmatpush.msra.mxu3 %v902_v51  ;;  %v1115_v50 = vld [vmem:[#allocation2 + $0x2a8] sm:$0xff] }
 0x2c1   :  { %954 = vmatpush.msrb.mxu2 %v885_v52  ;;  %983 = vmatpush.msra.mxu3 %v901_v54 }
 0x2c3   :  { %955 = vmatpush.msrb.mxu2 %v884_v57  ;;  %984 = vmatpush.msra.mxu3 %v900_v58 }
 0x2c5   :  { %956 = vmatpush.msrb.mxu2 %v883_v61  ;;  %985 = vmatpush.msra.mxu3 %v899_v62 }
 0x2c7   :  { %957 = vmatpush.msrb.mxu2 %v882_v2  ;;  %986 = vmatpush.msra.mxu3 %v898_v3 }
 0x2c9   :  { %958 = vmatpush.msrb.mxu2 %v881_v4  ;;  %987 = vmatpush.msra.mxu3 %v897_v14  ;;  %v1096_v4 = vld [vmem:[#allocation2 + $0x210] sm:$0xff] }
 0x2ca   :  { %v1112_v14 = vld [vmem:[#allocation2 + $0x290] sm:$0xff] }
 0x2cb   :  { %1126 = vmatpush.msra.mxu2 %v1109_v19  ;;  %1155 = vmatpush.msrb.mxu3 %v1125_v12 }
 0x2cd   :  { %1127 = vmatpush.msra.mxu2 %v1108_v13  ;;  %1156 = vmatpush.msrb.mxu3 %v1124_v21  ;;  %v1095_v21 = vld [vmem:[#allocation2 + $0x208] sm:$0xff] }
 0x2cf   :  { %1128 = vmatpush.msra.mxu2 %v1107_v15  ;;  %1157 = vmatpush.msrb.mxu3 %v1123_v22 }
 0x2d1   :  { %1129 = vmatpush.msra.mxu2 %v1106_v24  ;;  %1158 = vmatpush.msrb.mxu3 %v1122_v1  ;;  %v1111_v1 = vld [vmem:[#allocation2 + $0x288] sm:$0xff] }
 0x2d3   :  { %1130 = vmatpush.msra.mxu2 %v1105_v25  ;;  %1159 = vmatpush.msrb.mxu3 %v1121_v33 }
 0x2d5   :  { %1131 = vmatpush.msra.mxu2 %v1104_v34  ;;  %1160 = vmatpush.msrb.mxu3 %v1120_v35 }
 0x2d7   :  { %1132 = vmatpush.msra.mxu2 %v1103_v38  ;;  %1161 = vmatpush.msrb.mxu3 %v1119_v31  ;;  %v1094_v38 = vld [vmem:[#allocation2 + $0x200] sm:$0xff] }
 0x2d9   :  { %1133 = vmatpush.msra.mxu2 %v1102_v32  ;;  %1162 = vmatpush.msrb.mxu3 %v1118_v27  ;;  %v1110_v32 = vld [vmem:[#allocation2 + $0x280] sm:$0xff] }
 0x2db   :  { %1134 = vmatpush.msra.mxu2 %v1101_v30  ;;  %1163 = vmatpush.msrb.mxu3 %v1117_v40 }
 0x2dd   :  { %1135 = vmatpush.msra.mxu2 %v1100_v41  ;;  %1164 = vmatpush.msrb.mxu3 %v1116_v42 }
 0x2df   :  { %1136 = vmatpush.msra.mxu2 %v1099_v26  ;;  %1165 = vmatpush.msrb.mxu3 %v1115_v50 }
 0x2e1   :  { %1137 = vmatpush.msra.mxu2 %v1098_v56  ;;  %1166 = vmatpush.msrb.mxu3 %v1114_v28 }
 0x2e3   :  { %1138 = vmatpush.msra.mxu2 %v1097_v63  ;;  %1167 = vmatpush.msrb.mxu3 %v1113_v0 }
 0x2e5   :  { %1139 = vmatpush.msra.mxu2 %v1096_v4  ;;  %1168 = vmatpush.msrb.mxu3 %v1112_v14 }
 0x2e7   :  { %1140 = vmatpush.msra.mxu2 %v1095_v21  ;;  %1169 = vmatpush.msrb.mxu3 %v1111_v1  ;;  %v1198_v1 = vld [vmem:[%s2266_s7 + $0x50] sm:$0xff] }
 0x2e9   :  { %1141 = vmatpush.msra.mxu2 %v1094_v38  ;;  %1170 = vmatpush.msrb.mxu3 %v1110_v32  ;;  %v1196_v38 = vld [vmem:[%s2266_s7 + $0x40] sm:$0xff] }
 0x32d   :  { %v709_v36 = vpop.f32.mrf.mxu2  ;;  %v729_v37 = vpop.f32.mrf.mxu3 }
 0x32e   :  { %v775_v39 = vperm.slane %v709_v36, 0  ;;  %v776_v29 = vperm.slane %v729_v37, 0 }
 0x330   :  { %v777_v43 = vmul.f32 %v775_v39, %v2009_v5  ;;  %v779_v45 = vmul.f32 %v775_v39, %v2011_v6  ;;  %v781_v46 = vmul.f32 %v775_v39, %v2013_v7  ;;  %v778_v51 = vmul.f32 %v776_v29, %v2015_v8 }
 0x331   :  { %v780_v53 = vmul.f32 %v776_v29, %v2017_v9  ;;  %v782_v55 = vmul.f32 %v776_v29, %v2019_v10  ;;  %v783_v58 = vmul.f32 %v775_v39, %v2021_v11  ;;  %v784_v9 = vmul.f32 %v776_v29, %v2027_v20 }
 0x335   :  { %v752_v16 = vpop.f32.mrf.mxu2  ;;  %v772_v44 = vpop.f32.mrf.mxu3 }
 0x336   :  { %v785_v48 = vperm.slane %v752_v16, 0  ;;  %v786_v49 = vperm.slane %v772_v44, 0 }
 0x338   :  { %v787_v5 = vadd.f32 %v785_v48, %v777_v43  ;;  %v789_v52 = vadd.f32 %v785_v48, %v779_v45  ;;  %v791_v54 = vadd.f32 %v785_v48, %v781_v46  ;;  %v788_v6 = vadd.f32 %v786_v49, %v778_v51 }
 0x339   :  { %v790_v57 = vadd.f32 %v786_v49, %v780_v53  ;;  %v792_v7 = vadd.f32 %v786_v49, %v782_v55  ;;  %v793_v19 = vadd.f32 %v785_v48, %v783_v58  ;;  %v794_v12 = vadd.f32 %v786_v49, %v784_v9 }
 0x33a   :  { %v797_v59 = vmax.f32 %v789_v52, 0.0  ;;  %v799_v8 = vmax.f32 %v791_v54, 0.0  ;;  %v795_v60 = vmax.f32 %v787_v5, 0.0  ;;  %v796_v62 = vmax.f32 %v788_v6, 0.0 }
 0x33b   :  { %v798_v10 = vmax.f32 %v790_v57, 0.0  ;;  %v800_v61 = vmax.f32 %v792_v7, 0.0  ;;  %v801_v27 = vmax.f32 %v793_v19, 0.0  ;;  %v802_v30 = vmax.f32 %v794_v12, 0.0  ;;  %v1203_v12 = vld [vmem:[%s2266_s7 + $0x78] sm:$0xff] }
 0x33c   :  { %v814_v2 = vrot.slane %v797_v59, 7  ;;  %v812_v3 = vrot.slane %v795_v60, 7  ;;  %v813_v13 = vrot.slane %v796_v62, 7  ;;  %v818_v15 = vrot.slane %v799_v8, 7  ;;  %1216 = vmatpush.msrb.mxu0 %v1203_v12 }
 0x33d   :  { %v816_v11 = vrot.slane %v798_v10, 7  ;;  %v820_v22 = vrot.slane %v800_v61, 7  ;;  %v822_v41 = vrot.slane %v801_v27, 7  ;;  %v824_v43 = vrot.slane %v802_v30, 7  ;;  %v1194_v27 = vld [vmem:[%s2266_s7 + $0x30] sm:$0xff]  ;;  %v1192_v30 = vld [vmem:[%s2266_s7 + $0x20] sm:$0xff] }
 0x33e   :  { %v2060_v20 = vsel %vm811_vm11, 0.0, %v812_v3  ;;  %v2063_v24 = vsel %vm811_vm11, %v812_v3, %v814_v2  ;;  %v837_v25 = vsel %vm811_vm11, 0.0, %v813_v13  ;;  %v819_v29 = vsel %vm811_vm11, %v814_v2, %v818_v15 }
 0x33f   :  { %1490 = vmatmul.msk.f32.vlgmr.msra.gmra.mxu0 %vm113_vm1, %v2060_v20  ;;  %v917_v33 = vrot.slane %v2060_v20, 1  ;;  %v918_v34 = vrot.slane %v2063_v24, 1  ;;  %v2072_v35 = vsel %vm811_vm11, %v813_v13, %v816_v11  ;;  %1492 = vmatmul.msk.f32.vlgmr.msra.gmra.mxu1 %vm113_vm1, %v837_v25  ;;  %v920_v36 = vrot.slane %v837_v25, 1 }
 0x340   :  { %v921_v37 = vrot.slane %v2072_v35, 1  ;;  %v821_v17 = vsel %vm811_vm11, %v816_v11, %v820_v22  ;;  %v923_v40 = vrot.slane %v819_v29, 1  ;;  %v823_v26 = vsel %vm811_vm11, %v818_v15, %v822_v41  ;;  %v1202_v11 = vld [vmem:[%s2266_s7 + $0x70] sm:$0xff]  ;;  %v1200_v15 = vld [vmem:[%s2266_s7 + $0x60] sm:$0xff] }
 0x341   :  { %v919_v31 = vsel %vm175_vm0, %v917_v33, %v918_v34  ;;  %v925_v42 = vrot.slane %v821_v17, 1  ;;  %v825_v45 = vsel %vm811_vm11, %v820_v22, %v824_v43  ;;  %v927_v46 = vrot.slane %v823_v26, 1  ;;  %1217 = vmatpush.msrb.mxu0 %v1202_v11  ;;  %v1199_v22 = vld [vmem:[%s2266_s7 + $0x58] sm:$0xff]  ;;  %v1197_v33 = vld [vmem:[%s2266_s7 + $0x48] sm:$0xff] }
 0x342   :  { %959 = vmatmul.f32.vlgmr.msrb.gmra.mxu2 %v919_v31  ;;  %v922_v39 = vsel %vm175_vm0, %v920_v36, %v921_v37  ;;  %v924_v16 = vsel %vm175_vm0, %v918_v34, %v923_v40  ;;  %v929_v48 = vrot.slane %v825_v45, 1  ;;  %v838_v51 = vsel %vm811_vm11, %v822_v41, 0.0  ;;  %v1195_v31 = vld [vmem:[%s2266_s7 + $0x38] sm:$0xff] }
 0x343   :  { %988 = vmatmul.f32.vlgmr.msra.gmra.mxu3 %v922_v39  ;;  %v926_v44 = vsel %vm175_vm0, %v921_v37, %v925_v42  ;;  %v928_v49 = vsel %vm175_vm0, %v923_v40, %v927_v46  ;;  %v839_v53 = vsel %vm811_vm11, %v824_v43, 0.0  ;;  %v931_v55 = vrot.slane %v838_v51, 1  ;;  %1279 = vmatpush.msrb.mxu2 %v1203_v12  ;;  %v1193_v39 = vld [vmem:[%s2266_s7 + $0x28] sm:$0xff]  ;;  %v1191_v40 = vld [vmem:[%s2266_s7 + $0x18] sm:$0xff]  ;;  %v1190_v43 = vld [vmem:[%s2266_s7 + $0x10] sm:$0xff] }
 0x344   :  { %v930_v50 = vsel %vm175_vm0, %v925_v42, %v929_v48  ;;  %v933_v5 = vrot.slane %v839_v53, 1  ;;  %v1059_v54 = vrot.slane %v2060_v20, 2  ;;  %v1060_v56 = vrot.slane %v2063_v24, 2  ;;  %1218 = vmatpush.msrb.mxu0 %v1201_v23 }
 0x345   :  { %v932_v52 = vsel %vm175_vm0, %v927_v46, %v931_v55  ;;  %v1062_v28 = vrot.slane %v837_v25, 2  ;;  %v1063_v6 = vrot.slane %v2072_v35, 2  ;;  %v1065_v58 = vrot.slane %v819_v29, 2  ;;  %1280 = vmatpush.msrb.mxu2 %v1202_v11 }
 0x346   :  { %v934_v47 = vsel %vm175_vm0, %v929_v48, %v933_v5  ;;  %v1061_v57 = vsel %vm346_vm4, %v1059_v54, %v1060_v56  ;;  %v1067_v59 = vrot.slane %v821_v17, 2  ;;  %v1069_v9 = vrot.slane %v823_v26, 2  ;;  %1219 = vmatpush.msrb.mxu0 %v1200_v15 }
 0x347   :  { %1020 = vmatmul.f32.gmra.mxu0 %v2063_v24  ;;  %1049 = vmatmul.f32.gmra.mxu1 %v2072_v35  ;;  %v1064_v7 = vsel %vm346_vm4, %v1062_v28, %v1063_v6  ;;  %v1066_v8 = vsel %vm346_vm4, %v1060_v56, %v1065_v58  ;;  %v1071_v10 = vrot.slane %v825_v45, 2  ;;  %v1073_v63 = vrot.slane %v838_v51, 2 }
 0x348   :  { %v1068_v60 = vsel %vm346_vm4, %v1063_v6, %v1067_v59  ;;  %v1070_v61 = vsel %vm346_vm4, %v1065_v58, %v1069_v9  ;;  %v1075_v0 = vrot.slane %v839_v53, 2  ;;  %1281 = vmatpush.msrb.mxu2 %v1201_v23  ;;  %1220 = vmatpush.msrb.mxu0 %v1199_v22 }
 0x349   :  { %v1072_v62 = vsel %vm346_vm4, %v1067_v59, %v1071_v10  ;;  %v1074_v2 = vsel %vm346_vm4, %v1069_v9, %v1073_v63 }
 0x34a   :  { %962 = vmatmul.f32.gmra.mxu2 %v924_v16  ;;  %v1076_v3 = vsel %vm346_vm4, %v1071_v10, %v1075_v0  ;;  %1221 = vmatpush.msrb.mxu0 %v1198_v1  ;;  %v1204_v16 = vld [vmem:[%s2267_s8] sm:$0xff] }
 0x34b   :  { %991 = vmatmul.f32.gmra.mxu3 %v926_v44  ;;  %1282 = vmatpush.msrb.mxu2 %v1200_v15 }
 0x34c   :  { %1222 = vmatpush.msrb.mxu0 %v1197_v33  ;;  %1256 = vmatpush.msrb.mxu1 %v1204_v16 }
 0x34d   :  { %1283 = vmatpush.msrb.mxu2 %v1199_v22 }
 0x34e   :  { %1223 = vmatpush.msrb.mxu0 %v1196_v38  ;;  %1353 = vmatpush.msra.mxu1 %v1204_v16 }
 0x34f   :  { %1491 = vmatmul.msk.f32.gmra.mxu0 %vm115_vm3, %v819_v29  ;;  %1493 = vmatmul.msk.f32.gmra.mxu1 %vm115_vm3, %v821_v17 }
 0x350   :  { %1284 = vmatpush.msrb.mxu2 %v1198_v1  ;;  %1224 = vmatpush.msrb.mxu0 %v1195_v31 }
 0x352   :  { %965 = vmatmul.f32.gmra.mxu2 %v928_v49  ;;  %1225 = vmatpush.msrb.mxu0 %v1194_v27 }
 0x353   :  { %994 = vmatmul.f32.gmra.mxu3 %v930_v50  ;;  %1285 = vmatpush.msrb.mxu2 %v1197_v33  ;;  %v1188_v50 = vld [vmem:[%s2266_s7] sm:$0xff] }
 0x354   :  { %1226 = vmatpush.msrb.mxu0 %v1193_v39 }
 0x355   :  { %1286 = vmatpush.msrb.mxu2 %v1196_v38 }
 0x356   :  { %1227 = vmatpush.msrb.mxu0 %v1192_v30 }
 0x357   :  { %1026 = vmatmul.f32.gmra.mxu0 %v823_v26  ;;  %1055 = vmatmul.f32.gmra.mxu1 %v825_v45  ;;  %v1189_v45 = vld [vmem:[%s2266_s7 + $0x8] sm:$0xff] }
 0x358   :  { %1287 = vmatpush.msrb.mxu2 %v1195_v31  ;;  %1228 = vmatpush.msrb.mxu0 %v1191_v40 }
 0x35a   :  { %968 = vmatmul.f32.gmra.mxu2 %v932_v52  ;;  %1229 = vmatpush.msrb.mxu0 %v1190_v43 }
 0x35b   :  { %997 = vmatmul.f32.gmra.mxu3 %v934_v47  ;;  %1288 = vmatpush.msrb.mxu2 %v1194_v27 }
 0x35c   :  { %1230 = vmatpush.msrb.mxu0 %v1189_v45 }
 0x35d   :  { %1289 = vmatpush.msrb.mxu2 %v1193_v39 }
 0x35e   :  { %1231 = vmatpush.msrb.mxu0 %v1188_v50 }
 0x35f   :  { %1290 = vmatpush.msrb.mxu2 %v1192_v30 }
 0x360   :  { %1330 = vmatpush.msra.mxu0 %v1204_v16  ;;  %v1383_v16 = vld [vmem:[%s2262_s3 + $0x58] sm:$0xff] }
 0x361   :  { %1291 = vmatpush.msrb.mxu2 %v1191_v40  ;;  %v1387_v40 = vld [vmem:[%s2262_s3 + $0x78] sm:$0xff] }
 0x362   :  { %1142 = vmatmul.f32.vlgmr.msra.gmra.mxu2 %v1061_v57  ;;  %1390 = vmatpush.msra.mxu3 %v1387_v40 }
 0x363   :  { %1171 = vmatmul.f32.vlgmr.msrb.gmra.mxu3 %v1064_v7  ;;  %1292 = vmatpush.msrb.mxu2 %v1190_v43  ;;  %v1384_v43 = vld [vmem:[%s2262_s3 + $0x60] sm:$0xff] }
 0x365   :  { %1293 = vmatpush.msrb.mxu2 %v1189_v45  ;;  %v1382_v45 = vld [vmem:[%s2262_s3 + $0x50] sm:$0xff] }
 0x367   :  { %1294 = vmatpush.msrb.mxu2 %v1188_v50  ;;  %v1379_v50 = vld [vmem:[%s2262_s3 + $0x38] sm:$0xff] }
 0x36a   :  { %1494 = vmatmul.msk.f32.gmra.mxu2 %vm331_vm5, %v1066_v8 }
 0x36b   :  { %1496 = vmatmul.msk.f32.gmra.mxu3 %vm331_vm5, %v1068_v60 }
 0x372   :  { %1148 = vmatmul.f32.gmra.mxu2 %v1070_v61 }
 0x373   :  { %1177 = vmatmul.f32.gmra.mxu3 %v1072_v62 }
 0x37a   :  { %1495 = vmatmul.msk.f32.gmra.mxu2 %vm333_vm6, %v1074_v2 }
 0x37b   :  { %1497 = vmatmul.msk.f32.gmra.mxu3 %vm333_vm6, %v1076_v3 }
 0x3bc   :  { %v1018_v20 = vpop.f32.mrf.mxu0  ;;  %v1047_v34 = vpop.f32.mrf.mxu1 }
 0x3c4   :  { %v1021_v36 = vpop.f32.mrf.mxu0  ;;  %v1050_v32 = vpop.f32.mrf.mxu1 }
 0x3c5   :  { %v960_v18 = vpop.f32.mrf.mxu2 }
 0x3c6   :  { %v989_v4 = vpop.f32.mrf.mxu3 }
 0x3c7   :  { %v990_v44 = vadd.f32 %v989_v4, %v960_v18 }
 0x3c9   :  { %v1019_v53 = vadd.f32 %v1018_v20, %v990_v44 }
 0x3cb   :  { %v1048_v57 = vadd.f32 %v1047_v34, %v1019_v53 }
 0x3cc   :  { %v1024_v41 = vpop.f32.mrf.mxu0  ;;  %v1053_v46 = vpop.f32.mrf.mxu1 }
 0x3cd   :  { %v963_v14 = vpop.f32.mrf.mxu2 }
 0x3ce   :  { %v992_v19 = vpop.f32.mrf.mxu3 }
 0x3cf   :  { %v993_v42 = vadd.f32 %v992_v19, %v963_v14 }
 0x3d1   :  { %v1022_v48 = vadd.f32 %v1021_v36, %v993_v42  ;;  %v1385_v42 = vld [vmem:[%s2262_s3 + $0x68] sm:$0xff] }
 0x3d3   :  { %v1051_v54 = vadd.f32 %v1050_v32, %v1022_v48  ;;  %v1381_v48 = vld [vmem:[%s2262_s3 + $0x48] sm:$0xff] }
 0x3d4   :  { %v1027_v28 = vpop.f32.mrf.mxu0  ;;  %v1056_v9 = vpop.f32.mrf.mxu1 }
 0x3d5   :  { %v966_v13 = vpop.f32.mrf.mxu2 }
 0x3d6   :  { %v995_v21 = vpop.f32.mrf.mxu3 }
 0x3d7   :  { %v996_v26 = vadd.f32 %v995_v21, %v966_v13 }
 0x3d9   :  { %v1025_v55 = vadd.f32 %v1024_v41, %v996_v26  ;;  %v1386_v41 = vld [vmem:[%s2262_s3 + $0x70] sm:$0xff] }
 0x3da   :  { %1391 = vmatpush.msra.mxu3 %v1386_v41 }
 0x3db   :  { %v1054_v58 = vadd.f32 %v1053_v46, %v1025_v55  ;;  %v1377_v55 = vld [vmem:[%s2262_s3 + $0x28] sm:$0xff] }
 0x3dc   :  { %1392 = vmatpush.msra.mxu3 %v1385_v42 }
 0x3dd   :  { %v969_v24 = vpop.f32.mrf.mxu2 }
 0x3de   :  { %v998_v25 = vpop.f32.mrf.mxu3  ;;  %1393 = vmatpush.msra.mxu3 %v1384_v43 }
 0x3df   :  { %v999_v5 = vadd.f32 %v998_v25, %v969_v24 }
 0x3e0   :  { %1394 = vmatpush.msra.mxu3 %v1383_v16 }
 0x3e1   :  { %v1028_v6 = vadd.f32 %v1027_v28, %v999_v5  ;;  %v1205_v28 = vld [vmem:[%s2268_s9] sm:$0x1] }
 0x3e2   :  { %1395 = vmatpush.msra.mxu3 %v1382_v45 }
 0x3e3   :  { %v1057_v62 = vadd.f32 %v1056_v9, %v1028_v6 }
 0x3e4   :  { %1396 = vmatpush.msra.mxu3 %v1381_v48 }
 0x3e5   :  { %v1143_v35 = vpop.f32.mrf.mxu2 }
 0x3e6   :  { %v1172_v37 = vpop.f32.mrf.mxu3 }
 0x3e7   :  { %v1173_v47 = vadd.f32 %v1172_v37, %v1143_v35 }
 0x3e9   :  { %v1184_v59 = vadd.f32 %v1173_v47, %v1048_v57 }
 0x3ed   :  { %v1146_v29 = vpop.f32.mrf.mxu2 }
 0x3ee   :  { %v1175_v17 = vpop.f32.mrf.mxu3 }
 0x3ef   :  { %v1176_v52 = vadd.f32 %v1175_v17, %v1146_v29  ;;  %v1206_v17 = vld [vmem:[%s2268_s9 + $0x1] sm:$0x1] }
 0x3f1   :  { %v1185_v7 = vadd.f32 %v1176_v52, %v1051_v54  ;;  %v1376_v52 = vld [vmem:[%s2262_s3 + $0x20] sm:$0xff] }
 0x3f3   :  { %v1207_v61 = vadd.f32 %v1185_v7, %v1184_v59 }
 0x3f5   :  { %v1149_v49 = vpop.f32.mrf.mxu2 }
 0x3f6   :  { %v1178_v51 = vpop.f32.mrf.mxu3 }
 0x3f7   :  { %v1179_v56 = vadd.f32 %v1178_v51, %v1149_v49  ;;  %v1380_v49 = vld [vmem:[%s2262_s3 + $0x40] sm:$0xff]  ;;  %v1378_v51 = vld [vmem:[%s2262_s3 + $0x30] sm:$0xff] }
 0x3f8   :  { %1397 = vmatpush.msra.mxu3 %v1380_v49 }
 0x3f9   :  { %v1186_v8 = vadd.f32 %v1179_v56, %v1054_v58  ;;  %v1375_v58 = vld [vmem:[%s2262_s3 + $0x18] sm:$0xff] }
 0x3fa   :  { %1398 = vmatpush.msra.mxu3 %v1379_v50 }
 0x3fb   :  { %v1208_v0 = vadd.f32 %v1207_v61, %v1186_v8 }
 0x3fc   :  { %1399 = vmatpush.msra.mxu3 %v1378_v51 }
 0x3fd   :  { %v1152_v60 = vpop.f32.mrf.mxu2 }
 0x3fe   :  { %v1181_v10 = vpop.f32.mrf.mxu3  ;;  %1400 = vmatpush.msra.mxu3 %v1377_v55 }
 0x3ff   :  { %v1182_v63 = vadd.f32 %v1181_v10, %v1152_v60  ;;  %v1372_v60 = vld [vmem:[%s2262_s3] sm:$0xff] }
 0x400   :  { %1401 = vmatpush.msra.mxu3 %v1376_v52 }
 0x401   :  { %v1187_v2 = vadd.f32 %v1182_v63, %v1057_v62 }
 0x402   :  { %1402 = vmatpush.msra.mxu3 %v1375_v58 }
 0x403   :  { %v1209_v3 = vadd.f32 %v1208_v0, %v1187_v2 }
 0x405   :  { %v1210_v18 = vrot.slane %v1209_v3, 4 }
 0x407   :  { %v1211_v4 = vadd.f32 %v1210_v18, %v1209_v3 }
 0x409   :  { %v1212_v14 = vrot.slane %v1211_v4, 2 }
 0x40b   :  { %v1213_v19 = vadd.f32 %v1212_v14, %v1211_v4 }
 0x40d   :  { %v1214_v12 = vrot.slane %v1213_v19, 1 }
 0x40f   :  { %v1215_v11 = vadd.f32 %v1214_v12, %v1213_v19 }
 0x411   :  { %1232 = vmatmul.f32.vlgmr.msrb.gmra.mxu0 %v1215_v11 }
 0x48e   :  { %v1233_v13 = vpop.f32.mrf.mxu0 }
 0x48f   :  { %v1236_v23 = vmul.f32 0.001953125, %v1233_v13 }
 0x491   :  { %1498 = vmatmul.msk.f32.vlgmr.msrb.gmra.mxu1 %vm1237_vm12, %v1236_v23 }
 0x499   :  { %1500 = vmatmul.msk.f32.vlgmr.msra.gmra.mxu1 %vm1237_vm12, %v1206_v17 }
 0x50e   :  { %v1258_v21 = vpop.f32.mrf.mxu1 }
 0x50f   :  { %v1261_v15 = vperm.slane %v1258_v21, 0  ;;  %v1512_v21 = vld [vmem:[%s2262_s3 + $0x80] ss:$0 sm:$0xff] }
 0x511   :  { %v2168_v22 = vsub.f32 %v1184_v59, %v1261_v15  ;;  %v2170_v20 = vsub.f32 %v1185_v7, %v1261_v15  ;;  %v2172_v24 = vsub.f32 %v1186_v8, %v1261_v15  ;;  %v2174_v1 = vsub.f32 %v1187_v2, %v1261_v15  ;;  %v1374_v59 = vld [vmem:[%s2262_s3 + $0x10] sm:$0xff]  ;;  %v1373_v8 = vld [vmem:[%s2262_s3 + $0x8] sm:$0xff] }
 0x512   :  { %1403 = vmatpush.msra.mxu3 %v1374_v59 }
 0x513   :  { %v1266_v25 = vmul.f32 %v2168_v22, %v2168_v22  ;;  %v1267_v33 = vmul.f32 %v2170_v20, %v2170_v20  ;;  %v1268_v34 = vmul.f32 %v2172_v24, %v2172_v24  ;;  %v1269_v36 = vmul.f32 %v2174_v1, %v2174_v1 }
 0x514   :  { %1404 = vmatpush.msra.mxu3 %v1373_v8 }
 0x515   :  { %v1270_v35 = vadd.f32 %v1267_v33, %v1266_v25 }
 0x516   :  { %1405 = vmatpush.msra.mxu3 %v1372_v60  ;;  %v1355_v9 = vpop.f32.mrf.mxu1 }
 0x517   :  { %v1271_v37 = vadd.f32 %v1270_v35, %v1268_v34  ;;  %v1363_v62 = vperm.slane %v1355_v9, 0 }
 0x519   :  { %v1272_v38 = vadd.f32 %v1271_v37, %v1269_v36 }
 0x51b   :  { %v1273_v31 = vrot.slane %v1272_v38, 4 }
 0x51d   :  { %v1274_v32 = vadd.f32 %v1273_v31, %v1272_v38 }
 0x51f   :  { %v1275_v27 = vrot.slane %v1274_v32, 2 }
 0x521   :  { %v1276_v39 = vadd.f32 %v1275_v27, %v1274_v32 }
 0x523   :  { %v1277_v29 = vrot.slane %v1276_v39, 1 }
 0x525   :  { %v1278_v30 = vadd.f32 %v1277_v29, %v1276_v39 }
 0x527   :  { %1295 = vmatmul.f32.vlgmr.msrb.gmra.mxu2 %v1278_v30 }
 0x5aa   :  { %v1296_v44 = vpop.f32.mrf.mxu2 }
 0x5ab   :  { %v1299_v26 = vmul.f32 0.001953125, %v1296_v44 }
 0x5ad   :  { %v1300_v46 = vadd.f32 1e-05, %v1299_v26 }
 0x5af   :  { %1515 = vrsqrt.f32 %v1300_v46  ;;  %vm1307_vm14 = vweird.f32 %v1300_v46 }
 0x5b5   :  { %v1516_v53 = vpop.eup %1515 }
 0x5b6   :  { %v1302_v5 = vmul.f32 %v1516_v53, %v1300_v46  ;;  %vm1308_vm13 = vweird.f32 %v1516_v53 }
 0x5b7   :  { %vm1309_vm15 = vmor %vm1307_vm14, %vm1308_vm13 }
 0x5b8   :  { %v1303_v47 = vmul.f32 %v1516_v53, %v1302_v5 }
 0x5ba   :  { %v1304_v54 = vmul.f32 0.5, %v1303_v47 }
 0x5bc   :  { %v1305_v56 = vsub.f32 1.5, %v1304_v54 }
 0x5be   :  { %v1306_v6 = vmul.f32 %v1516_v53, %v1305_v56 }
 0x5c0   :  { %v1310_v57 = vsel %vm1309_vm15, %v1516_v53, %v1306_v6 }
 0x5c1   :  { %v1311_v7 = vmul.f32 %v1310_v57, %v1205_v28 }
 0x5c3   :  { %1499 = vmatmul.msk.f32.vlgmr.msra.gmra.mxu0 %vm1237_vm12, %v1311_v7 }
 0x640   :  { %v1332_v10 = vpop.f32.mrf.mxu0 }
 0x641   :  { %v1358_v61 = vperm.slane %v1332_v10, 0 }
 0x643   :  { %v1359_v63 = vmul.f32 %v1358_v61, %v2168_v22  ;;  %v1360_v3 = vmul.f32 %v1358_v61, %v2170_v20  ;;  %v1361_v14 = vmul.f32 %v1358_v61, %v2172_v24  ;;  %v1362_v11 = vmul.f32 %v1358_v61, %v2174_v1 }
 0x645   :  { %v1364_v0 = vadd.f32 %v1363_v62, %v1359_v63  ;;  %v1365_v18 = vadd.f32 %v1363_v62, %v1360_v3  ;;  %v1366_v19 = vadd.f32 %v1363_v62, %v1361_v14  ;;  %v1367_v13 = vadd.f32 %v1363_v62, %v1362_v11 }
 0x647   :  { %v1368_v2 = vmax.f32 %v1364_v0, 0.0  ;;  %v1369_v4 = vmax.f32 %v1365_v18, 0.0  ;;  %v1370_v12 = vmax.f32 %v1366_v19, 0.0  ;;  %v1371_v23 = vmax.f32 %v1367_v13, 0.0 }
 0x649   :  { %1406 = vmatmul.f32.vlgmr.msra.gmra.mxu3 %v1368_v2 }
 0x651   :  { %1409 = vmatmul.f32.gmra.mxu3 %v1369_v4 }
 0x659   :  { %1412 = vmatmul.f32.gmra.mxu3 %v1370_v12 }
 0x661   :  { %1415 = vmatmul.f32.gmra.mxu3 %v1371_v23 }
 0x6cc   :  { %v1407_v15 = vpop.f32.mrf.mxu3 }
 0x6cd   :  { %v1408_v22 = vadd.f32 %v1512_v21, %v1407_v15 }
 0x6cf   :  { %1419 = vst [vmem:[%s2269_s10] sm:$0xff] %v1408_v22 }
 0x6d4   :  { %v1410_v20 = vpop.f32.mrf.mxu3 }
 0x6d5   :  { %v1411_v24 = vadd.f32 %v1512_v21, %v1410_v20 }
 0x6d7   :  { %1420 = vst [vmem:[%s2269_s10 + $0x8] sm:$0xff] %v1411_v24 }
 0x6dc   :  { %v1413_v1 = vpop.f32.mrf.mxu3 }
 0x6dd   :  { %v1414_v25 = vadd.f32 %v1512_v21, %v1413_v1 }
 0x6df   :  { %1421 = vst [vmem:[%s2269_s10 + $0x10] sm:$0xff] %v1414_v25 }
 0x6e4   :  { %v1416_v33 = vpop.f32.mrf.mxu3 }
 0x6e5   :  { %v1417_v34 = vadd.f32 %v1512_v21, %v1416_v33 }
 0x6e7   :  { %1422 = vst [vmem:[%s2269_s10 + $0x18] sm:$0xff] %v1417_v34 }
 0x6e8   :  { %1427 = vsyncpa [#allocation3], 1 }

</bundles_post_ra>
